<compile_context>
chip_gen: v7x
topology: tpu7x:2x2x1
jax: 0.10.0
libtpu: 0.0.40
codegen_flags: <defaults>
</compile_context>

<pallas_src>
import functools

import jax
import jax.numpy as jnp
from jax.experimental import pallas as pl
from jax.experimental.pallas import tpu as pltpu


def _gather_kernel(ids_ref, table_hbm, out_ref, sems, *, token_tile):
    # ids_ref:   (N_pad,)         int32 token ids, scalar-prefetched into SMEM
    # table_hbm: (V, D)           embedding table, left in HBM (pl.ANY)
    # out_ref:   (token_tile, D)  VMEM output block for this grid step
    # sems:      (token_tile,)    DMA semaphores, one per row copy
    base = pl.program_id(0) * token_tile

    # Issue all row-gather DMAs for this token tile.
    @pl.loop(0, token_tile)
    def _start(t):
        tok = ids_ref[base + t]
        pltpu.make_async_copy(
            table_hbm.at[pl.ds(tok, 1), :],
            out_ref.at[pl.ds(t, 1), :],
            sems.at[t],
        ).start()

    # Drain them before the pipeline writes the output block back to HBM.
    @pl.loop(0, token_tile)
    def _wait(t):
        tok = ids_ref[base + t]
        pltpu.make_async_copy(
            table_hbm.at[pl.ds(tok, 1), :],
            out_ref.at[pl.ds(t, 1), :],
            sems.at[t],
        ).wait()


def simple_embedding(x_ids, table, *, token_tile=256):
    """Embedding lookup: x_ids [B, S] int -> [B, S, D] embeddings."""
    B, S = x_ids.shape
    V, D = table.shape
    assert token_tile % 8 == 0, "token_tile must be a multiple of 8"

    flat_ids = x_ids.reshape(-1).astype(jnp.int32)  # (N,)
    N = flat_ids.shape[0]

    # Pad the token stream so the grid divides evenly; padded slots gather a
    # valid row (0 after clamping) and are dropped afterwards.
    n_pad = pl.cdiv(N, token_tile) * token_tile
    if n_pad != N:
        flat_ids = jnp.concatenate(
            [flat_ids, jnp.zeros((n_pad - N,), jnp.int32)])
    # Clamp ids: with a DMA gather, out-of-range ids would otherwise read an
    # arbitrary HBM row.
    flat_ids = jnp.clip(flat_ids, 0, V - 1)

    kernel = functools.partial(_gather_kernel, token_tile=token_tile)

    out_flat = pl.pallas_call(
        kernel,
        out_shape=jax.ShapeDtypeStruct((n_pad, D), table.dtype),
        grid_spec=pltpu.PrefetchScalarGridSpec(
            num_scalar_prefetch=1,                     # ids -> SMEM
            grid=(n_pad // token_tile,),
            in_specs=[
                pl.BlockSpec(memory_space=pl.ANY),     # table stays in HBM
            ],
            out_specs=pl.BlockSpec((token_tile, D), lambda i, ids: (i, 0)),
            scratch_shapes=[pltpu.SemaphoreType.DMA((token_tile,))],
        ),
        compiler_params=pltpu.CompilerParams(
            dimension_semantics=("arbitrary",)),
    )(flat_ids, table)

    return out_flat[:N].reshape(B, S, D)


if __name__ == "__main__":
    # Synthetic "tokenizer": vocab size 32, pad token id 0.
    VOCAB = 32
    EMB_DIM = 32
    PAD_IDX = 0
    B, S = 2, 8

    key = jax.random.PRNGKey(0)
    k_table, k_ids = jax.random.split(key)

    # nn.Embedding init: N(0, 1); padding_idx row zeroed.
    table = jax.random.normal(k_table, (VOCAB, EMB_DIM), dtype=jnp.float32)
    table = table.at[PAD_IDX].set(0.0)

    # Token ids, including some pad tokens.
    x_ids = jax.random.randint(k_ids, (B, S), minval=0, maxval=VOCAB,
                               dtype=jnp.int32)
    x_ids = x_ids.at[0, 0].set(PAD_IDX)  # ensure a pad token appears

    out = simple_embedding(x_ids, table)
    out = jax.block_until_ready(out)

    # Reference check: plain JAX gather.
    ref = table[x_ids]
    assert out.shape == (B, S, EMB_DIM)
    assert jnp.allclose(out, ref, atol=1e-6), "mismatch vs reference gather"
    assert jnp.allclose(out[0, 0], 0.0), "pad row should be zero"

    print("KERNEL_OK")
</pallas_src>

<mosaic_0001>
module attributes {stable_mosaic.version = 11 : i64} {
  func.func @_gather_kernel(%arg0: i32, %arg1: memref<256xi32, #tpu.memory_space<smem>>, %arg2: memref<32x32xf32, #tpu.memory_space<any>>, %arg3: memref<256x32xf32, #tpu.memory_space<vmem>>, %arg4: memref<256x!tpu.dma_semaphore, #tpu.memory_space<semaphore_mem>>) attributes {dimension_semantics = [#tpu.dimension_semantics<arbitrary>], iteration_bounds = array<i64: 1>, scalar_prefetch = 1 : i64, scratch_operands = 1 : i64, tpu.core_type = #tpu.core_type<tc>, window_params = [{}, {transform_indices = @transform_1, window_bounds = array<i64: 256, 32>}]} {
    %c256_i32 = arith.constant 256 : i32
    %0 = arith.muli %arg0, %c256_i32 : i32
    %c0_i32 = arith.constant 0 : i32
    %c256_i32_0 = arith.constant 256 : i32
    %1 = arith.addi %c0_i32, %c256_i32_0 : i32
    %c1_i32 = arith.constant 1 : i32
    scf.for %arg5 = %c0_i32 to %1 step %c1_i32  : i32 {
      %c1_i32_6 = arith.constant 1 : i32
      %3 = arith.muli %arg5, %c1_i32_6 : i32
      %c0_i32_7 = arith.constant 0 : i32
      %4 = arith.addi %c0_i32_7, %3 : i32
      %5 = arith.addi %0, %4 : i32
      %6 = arith.index_cast %5 : i32 to index
      %7 = memref.load %arg1[%6] : memref<256xi32, #tpu.memory_space<smem>>
      %c0_i32_8 = arith.constant 0 : i32
      %8 = tpu.memref_slice %arg2[%7, %c0_i32_8] : memref<32x32xf32, #tpu.memory_space<any>> -> memref<1x32xf32, #tpu.memory_space<any>>
      %c0_i32_9 = arith.constant 0 : i32
      %9 = tpu.memref_slice %arg3[%4, %c0_i32_9] : memref<256x32xf32, #tpu.memory_space<vmem>> -> memref<1x32xf32, #tpu.memory_space<vmem>>
      %10 = tpu.memref_slice %arg4[%4] : memref<256x!tpu.dma_semaphore, #tpu.memory_space<semaphore_mem>> -> memref<1x!tpu.dma_semaphore, #tpu.memory_space<semaphore_mem>>
      %11 = tpu.memref_squeeze %10 : memref<1x!tpu.dma_semaphore, #tpu.memory_space<semaphore_mem>> -> memref<!tpu.dma_semaphore, #tpu.memory_space<semaphore_mem>>
      tpu.enqueue_dma source(%8 : memref<1x32xf32, #tpu.memory_space<any>>) target(%9 : memref<1x32xf32, #tpu.memory_space<vmem>>) target_semaphore(%11 : memref<!tpu.dma_semaphore, #tpu.memory_space<semaphore_mem>>)
    }
    %c256_i32_1 = arith.constant 256 : i32
    %c0_i32_2 = arith.constant 0 : i32
    %c256_i32_3 = arith.constant 256 : i32
    %2 = arith.addi %c0_i32_2, %c256_i32_3 : i32
    %c1_i32_4 = arith.constant 1 : i32
    scf.for %arg5 = %c0_i32_2 to %2 step %c1_i32_4  : i32 {
      %c1_i32_6 = arith.constant 1 : i32
      %3 = arith.muli %arg5, %c1_i32_6 : i32
      %c0_i32_7 = arith.constant 0 : i32
      %4 = arith.addi %c0_i32_7, %3 : i32
      %5 = arith.addi %0, %4 : i32
      %6 = arith.index_cast %5 : i32 to index
      %7 = memref.load %arg1[%6] : memref<256xi32, #tpu.memory_space<smem>>
      %c0_i32_8 = arith.constant 0 : i32
      %8 = tpu.memref_slice %arg2[%7, %c0_i32_8] : memref<32x32xf32, #tpu.memory_space<any>> -> memref<1x32xf32, #tpu.memory_space<any>>
      %c0_i32_9 = arith.constant 0 : i32
      %9 = tpu.memref_slice %arg3[%4, %c0_i32_9] : memref<256x32xf32, #tpu.memory_space<vmem>> -> memref<1x32xf32, #tpu.memory_space<vmem>>
      %10 = tpu.memref_slice %arg4[%4] : memref<256x!tpu.dma_semaphore, #tpu.memory_space<semaphore_mem>> -> memref<1x!tpu.dma_semaphore, #tpu.memory_space<semaphore_mem>>
      %11 = tpu.memref_squeeze %10 : memref<1x!tpu.dma_semaphore, #tpu.memory_space<semaphore_mem>> -> memref<!tpu.dma_semaphore, #tpu.memory_space<semaphore_mem>>
      tpu.wait_dma2 semaphore(%11 : memref<!tpu.dma_semaphore, #tpu.memory_space<semaphore_mem>>) src(%8 : memref<1x32xf32, #tpu.memory_space<any>>) dst(%9 : memref<1x32xf32, #tpu.memory_space<vmem>>)
    }
    %c256_i32_5 = arith.constant 256 : i32
    return
  }
  func.func @transform_1(%arg0: i32, %arg1: memref<256xi32, #tpu.memory_space<smem>>) -> (i32, i32) {
    %c0_i32 = arith.constant 0 : i32
    %c0_i32_0 = arith.constant 0 : i32
    return %arg0, %c0_i32 : i32, i32
  }
}

</mosaic_0001>

<bundles_post_ra>
// kernel: tpu_custom_call.1
= control target key start
LH: loop header
LB: loop body
LE: loop exit
PB: predicated region body
PF: predicated region fallthrough
CT: control target
= control target key end

     0   :  { %s2239_s0 = inlined_call_operand.hbm [shape: s32[256], index: 0, kind: input, shape index: {}]   ;;  %s2240_s1 = inlined_call_operand.hbm [shape: f32[32,32], index: 1, kind: input, shape index: {}]   ;;  %s2241_s2 = inlined_call_operand.vmem [shape: f32[256,32], index: 2, kind: output, shape index: {}]  }
   0x1   :  { %s2131_s11 = scalar_lea.hbm %s2239_s0, 32 }
   0x2   :  { %p2132_p0 = scmp.ne.s32.totalorder %s2239_s0, %s2131_s11  ;;  %p2135_p1 = scmp.lt.u32.totalorder %s2131_s11, %s2239_s0 }
   0x4   :  { %p2137_p2 = pnand %p2135_p1, %p2132_p0 }
   0x6   :  { %2140 = shalt.err (!%p2137_p2)  }
   0x7   :  { %s2185_s16 = smov [#allocation4]  }
   0x8   :  { %8 = dma.hbm_to_smem %s2239_s0, 32, %s2185_s16, [#allocation3] }
   0x9   :  { %2173 = dma.done.wait [#allocation3], 32 }
   0xa   :  { %2174 = vsyncadd [#allocation3], 4294967264 }
   0xb   :  { %10 = sfence }
   0xc   :  { %s2213_s19 = smov 0  }
   0xd LB: > { %s19_s20 = sld [smem:[#allocation4 + %s2179_s19]]  ;;  %s22_s23 = scalar_lea.vmem %s2241_s2, %s2179_s19  ;;  %s2179_s19 = sphi %s2213_s19, %s17_s19  }
   0xe   : > { %s31_s24 = sshll.u32 %s22_s23, 4  ;;  %s23_s28 = scalar_lea.sflag [#allocation2], %s2179_s19  ;;  %s32_s24 = int_to_ptr.vmem [resolvable:$true] %s31_s24 }
   0xf   : > { %s2143_s4 = scalar_lea.hbm %s2240_s1, 512 }
  0x13   : > { %s1857_s0 = sshll.u32 %s19_s20, 4 }
  0x14   : > { %s21_s27 = scalar_lea.hbm %s2240_s1, %s1857_s0 }
  0x15   : > { %s2141_s29 = scalar_lea.hbm %s21_s27, 16  ;;  %p2144_p4 = scmp.lt.u32.totalorder %s21_s27, %s2240_s1 }
  0x16   : > { %p2142_p3 = scmp.ne.s32.totalorder %s21_s27, %s2141_s29  ;;  %p2145_p5 = scmp.lt.u32.totalorder %s2143_s4, %s2141_s29 }
  0x17   : > { %p2147_p7 = scmp.lt.u32.totalorder %s2141_s29, %s21_s27 }
  0x18   : > { %p2146_p6 = por %p2145_p5, %p2144_p4 }
  0x1a   : > { %p2148_p8 = por %p2147_p7, %p2146_p6 }
  0x1c   : > { %p2149_p9 = pnand %p2148_p8, %p2142_p3 }
  0x1e   : > { %2152 = shalt.err (!%p2149_p9)  }
  0x1f   : > { %s2153_s7 = scalar_lea.vmem %s32_s24, 16  ;;  %s2155_s10 = sshll.u32 %s2241_s2, 4  ;;  %s2156_s10 = int_to_ptr.vmem [resolvable:$false] %s2155_s10 }
  0x20   : > { %p2154_p10 = scmp.ne.s32.totalorder %s32_s24, %s2153_s7  ;;  %s2157_s11 = scalar_lea.vmem %s2156_s10, 4096 }
  0x21   : > { %p2158_p11 = scmp.lt.s32.totalorder %s32_s24, %s2156_s10  ;;  %p2159_p12 = scmp.lt.s32.totalorder %s2157_s11, %s2153_s7 }
  0x23   : > { %p2160_p13 = por %p2159_p12, %p2158_p11 }
  0x25   : > { %p2161_p0 = pnand %p2160_p13, %p2154_p10 }
  0x27   : > { %2164 = shalt.err (!%p2161_p0)  }
  0x28   : > { %34 = dma.hbm_to_vmem [thread:$0]  %s21_s27, 16, %s32_s24, %s23_s28 }
  0x29   : > { %s17_s19 = sadd.s32 1, %s2179_s19  }
  0x2a   : > { %p14_p1 = scmp.ge.s32.totalorder %s17_s19, 256  }
  0x2b   :  { %s2181_s12 = smov (%p14_p1), 0  }
  0x2c   :  { %16 = sbr.rel (!%p14_p1) target bundleno = 13 (0xd), region = 297 }
  0x33 LB: > { %s43_s13 = scalar_lea.sflag [#allocation2], %s2183_s12  ;;  %s2183_s12 = sphi %s2181_s12, %s40_s12  }
  0x34   : > { %2175 = dma.done.wait %s43_s13, 16 }
  0x35   : > { %2176 = vsyncadd %s43_s13, 4294967280  ;;  %s40_s12 = sadd.s32 1, %s2183_s12  }
  0x36   : > { %p37_p2 = scmp.ge.s32.totalorder %s40_s12, 256  }
  0x38   :  { %39 = sbr.rel (!%p37_p2) target bundleno = 51 (0x33), region = 308 }
  0x3f   :  { %51 = vsyncmov [#allocation2] }
  0x42   :  { %s52_s14 = vpop.sfrf %51 }
  0x43   :  { %p1858_p3 = scmp.ne.s32.totalorder %s52_s14, 0 }
  0x45   :  { %56 = shalt.err (%p1858_p3)  }
  0x46   :  { %58 = vsyncmov [#allocation2 + $0x1] }
  0x49   :  { %s59_s15 = vpop.sfrf %58 }
  0x4a   :  { %p1859_p4 = scmp.ne.s32.totalorder %s59_s15, 0 }
  0x4c   :  { %63 = shalt.err (%p1859_p4)  }
  0x4d   :  { %65 = vsyncmov [#allocation2 + $0x2] }
  0x50   :  { %s66_s1 = vpop.sfrf %65 }
  0x51   :  { %p1860_p5 = scmp.ne.s32.totalorder %s66_s1, 0 }
  0x53   :  { %70 = shalt.err (%p1860_p5)  }
  0x54   :  { %72 = vsyncmov [#allocation2 + $0x3] }
  0x57   :  { %s73_s2 = vpop.sfrf %72 }
  0x58   :  { %p1861_p6 = scmp.ne.s32.totalorder %s73_s2, 0 }
  0x5a   :  { %77 = shalt.err (%p1861_p6)  }
  0x5b   :  { %79 = vsyncmov [#allocation2 + $0x4] }
  0x5e   :  { %s80_s16 = vpop.sfrf %79 }
  0x5f   :  { %p1862_p7 = scmp.ne.s32.totalorder %s80_s16, 0 }
  0x61   :  { %84 = shalt.err (%p1862_p7)  }
  0x62   :  { %86 = vsyncmov [#allocation2 + $0x5] }
  0x65   :  { %s87_s17 = vpop.sfrf %86 }
  0x66   :  { %p1863_p8 = scmp.ne.s32.totalorder %s87_s17, 0 }
  0x68   :  { %91 = shalt.err (%p1863_p8)  }
  0x69   :  { %93 = vsyncmov [#allocation2 + $0x6] }
  0x6c   :  { %s94_s18 = vpop.sfrf %93 }
  0x6d   :  { %p1864_p9 = scmp.ne.s32.totalorder %s94_s18, 0 }
  0x6f   :  { %98 = shalt.err (%p1864_p9)  }
  0x70   :  { %100 = vsyncmov [#allocation2 + $0x7] }
  0x73   :  { %s101_s19 = vpop.sfrf %100 }
  0x74   :  { %p1865_p10 = scmp.ne.s32.totalorder %s101_s19, 0 }
  0x76   :  { %105 = shalt.err (%p1865_p10)  }
  0x77   :  { %107 = vsyncmov [#allocation2 + $0x8] }
  0x7a   :  { %s108_s20 = vpop.sfrf %107 }
  0x7b   :  { %p1866_p11 = scmp.ne.s32.totalorder %s108_s20, 0 }
  0x7d   :  { %112 = shalt.err (%p1866_p11)  }
  0x7e   :  { %114 = vsyncmov [#allocation2 + $0x9] }
  0x81   :  { %s115_s21 = vpop.sfrf %114 }
  0x82   :  { %p1867_p12 = scmp.ne.s32.totalorder %s115_s21, 0 }
  0x84   :  { %119 = shalt.err (%p1867_p12)  }
  0x85   :  { %121 = vsyncmov [#allocation2 + $0xa] }
  0x88   :  { %s122_s22 = vpop.sfrf %121 }
  0x89   :  { %p1868_p13 = scmp.ne.s32.totalorder %s122_s22, 0 }
  0x8b   :  { %126 = shalt.err (%p1868_p13)  }
  0x8c   :  { %128 = vsyncmov [#allocation2 + $0xb] }
  0x8f   :  { %s129_s23 = vpop.sfrf %128 }
  0x90   :  { %p1869_p0 = scmp.ne.s32.totalorder %s129_s23, 0 }
  0x92   :  { %133 = shalt.err (%p1869_p0)  }
  0x93   :  { %135 = vsyncmov [#allocation2 + $0xc] }
  0x96   :  { %s136_s24 = vpop.sfrf %135 }
  0x97   :  { %p1870_p1 = scmp.ne.s32.totalorder %s136_s24, 0 }
  0x99   :  { %140 = shalt.err (%p1870_p1)  }
  0x9a   :  { %142 = vsyncmov [#allocation2 + $0xd] }
  0x9d   :  { %s143_s0 = vpop.sfrf %142 }
  0x9e   :  { %p1871_p2 = scmp.ne.s32.totalorder %s143_s0, 0 }
  0xa0   :  { %147 = shalt.err (%p1871_p2)  }
  0xa1   :  { %149 = vsyncmov [#allocation2 + $0xe] }
  0xa4   :  { %s150_s25 = vpop.sfrf %149 }
  0xa5   :  { %p1872_p3 = scmp.ne.s32.totalorder %s150_s25, 0 }
  0xa7   :  { %154 = shalt.err (%p1872_p3)  }
  0xa8   :  { %156 = vsyncmov [#allocation2 + $0xf] }
  0xab   :  { %s157_s26 = vpop.sfrf %156 }
  0xac   :  { %p1873_p4 = scmp.ne.s32.totalorder %s157_s26, 0 }
  0xae   :  { %161 = shalt.err (%p1873_p4)  }
  0xaf   :  { %163 = vsyncmov [#allocation2 + $0x10] }
  0xb2   :  { %s164_s27 = vpop.sfrf %163 }
  0xb3   :  { %p1874_p5 = scmp.ne.s32.totalorder %s164_s27, 0 }
  0xb5   :  { %168 = shalt.err (%p1874_p5)  }
  0xb6   :  { %170 = vsyncmov [#allocation2 + $0x11] }
  0xb9   :  { %s171_s28 = vpop.sfrf %170 }
  0xba   :  { %p1875_p6 = scmp.ne.s32.totalorder %s171_s28, 0 }
  0xbc   :  { %175 = shalt.err (%p1875_p6)  }
  0xbd   :  { %177 = vsyncmov [#allocation2 + $0x12] }
  0xc0   :  { %s178_s29 = vpop.sfrf %177 }
  0xc1   :  { %p1876_p7 = scmp.ne.s32.totalorder %s178_s29, 0 }
  0xc3   :  { %182 = shalt.err (%p1876_p7)  }
  0xc4   :  { %184 = vsyncmov [#allocation2 + $0x13] }
  0xc7   :  { %s185_s30 = vpop.sfrf %184 }
  0xc8   :  { %p1877_p8 = scmp.ne.s32.totalorder %s185_s30, 0 }
  0xca   :  { %189 = shalt.err (%p1877_p8)  }
  0xcb   :  { %191 = vsyncmov [#allocation2 + $0x14] }
  0xce   :  { %s192_s3 = vpop.sfrf %191 }
  0xcf   :  { %p1878_p9 = scmp.ne.s32.totalorder %s192_s3, 0 }
  0xd1   :  { %196 = shalt.err (%p1878_p9)  }
  0xd2   :  { %198 = vsyncmov [#allocation2 + $0x15] }
  0xd5   :  { %s199_s4 = vpop.sfrf %198 }
  0xd6   :  { %p1879_p10 = scmp.ne.s32.totalorder %s199_s4, 0 }
  0xd8   :  { %203 = shalt.err (%p1879_p10)  }
  0xd9   :  { %205 = vsyncmov [#allocation2 + $0x16] }
  0xdc   :  { %s206_s5 = vpop.sfrf %205 }
  0xdd   :  { %p1880_p11 = scmp.ne.s32.totalorder %s206_s5, 0 }
  0xdf   :  { %210 = shalt.err (%p1880_p11)  }
  0xe0   :  { %212 = vsyncmov [#allocation2 + $0x17] }
  0xe3   :  { %s213_s6 = vpop.sfrf %212 }
  0xe4   :  { %p1881_p12 = scmp.ne.s32.totalorder %s213_s6, 0 }
  0xe6   :  { %217 = shalt.err (%p1881_p12)  }
  0xe7   :  { %219 = vsyncmov [#allocation2 + $0x18] }
  0xea   :  { %s220_s7 = vpop.sfrf %219 }
  0xeb   :  { %p1882_p13 = scmp.ne.s32.totalorder %s220_s7, 0 }
  0xed   :  { %224 = shalt.err (%p1882_p13)  }
  0xee   :  { %226 = vsyncmov [#allocation2 + $0x19] }
  0xf1   :  { %s227_s8 = vpop.sfrf %226 }
  0xf2   :  { %p1883_p0 = scmp.ne.s32.totalorder %s227_s8, 0 }
  0xf4   :  { %231 = shalt.err (%p1883_p0)  }
  0xf5   :  { %233 = vsyncmov [#allocation2 + $0x1a] }
  0xf8   :  { %s234_s9 = vpop.sfrf %233 }
  0xf9   :  { %p1884_p1 = scmp.ne.s32.totalorder %s234_s9, 0 }
  0xfb   :  { %238 = shalt.err (%p1884_p1)  }
  0xfc   :  { %240 = vsyncmov [#allocation2 + $0x1b] }
  0xff   :  { %s241_s10 = vpop.sfrf %240 }
 0x100   :  { %p1885_p2 = scmp.ne.s32.totalorder %s241_s10, 0 }
 0x102   :  { %245 = shalt.err (%p1885_p2)  }
 0x103   :  { %247 = vsyncmov [#allocation2 + $0x1c] }
 0x106   :  { %s248_s11 = vpop.sfrf %247 }
 0x107   :  { %p1886_p3 = scmp.ne.s32.totalorder %s248_s11, 0 }
 0x109   :  { %252 = shalt.err (%p1886_p3)  }
 0x10a   :  { %254 = vsyncmov [#allocation2 + $0x1d] }
 0x10d   :  { %s255_s12 = vpop.sfrf %254 }
 0x10e   :  { %p1887_p4 = scmp.ne.s32.totalorder %s255_s12, 0 }
 0x110   :  { %259 = shalt.err (%p1887_p4)  }
 0x111   :  { %261 = vsyncmov [#allocation2 + $0x1e] }
 0x114   :  { %s262_s13 = vpop.sfrf %261 }
 0x115   :  { %p1888_p5 = scmp.ne.s32.totalorder %s262_s13, 0 }
 0x117   :  { %266 = shalt.err (%p1888_p5)  }
 0x118   :  { %268 = vsyncmov [#allocation2 + $0x1f] }
 0x11b   :  { %s269_s14 = vpop.sfrf %268 }
 0x11c   :  { %p1889_p6 = scmp.ne.s32.totalorder %s269_s14, 0 }
 0x11e   :  { %273 = shalt.err (%p1889_p6)  }
 0x11f   :  { %275 = vsyncmov [#allocation2 + $0x20] }
 0x122   :  { %s276_s15 = vpop.sfrf %275 }
 0x123   :  { %p1890_p7 = scmp.ne.s32.totalorder %s276_s15, 0 }
 0x125   :  { %280 = shalt.err (%p1890_p7)  }
 0x126   :  { %282 = vsyncmov [#allocation2 + $0x21] }
 0x129   :  { %s283_s1 = vpop.sfrf %282 }
 0x12a   :  { %p1891_p8 = scmp.ne.s32.totalorder %s283_s1, 0 }
 0x12c   :  { %287 = shalt.err (%p1891_p8)  }
 0x12d   :  { %289 = vsyncmov [#allocation2 + $0x22] }
 0x130   :  { %s290_s2 = vpop.sfrf %289 }
 0x131   :  { %p1892_p9 = scmp.ne.s32.totalorder %s290_s2, 0 }
 0x133   :  { %294 = shalt.err (%p1892_p9)  }
 0x134   :  { %296 = vsyncmov [#allocation2 + $0x23] }
 0x137   :  { %s297_s16 = vpop.sfrf %296 }
 0x138   :  { %p1893_p10 = scmp.ne.s32.totalorder %s297_s16, 0 }
 0x13a   :  { %301 = shalt.err (%p1893_p10)  }
 0x13b   :  { %303 = vsyncmov [#allocation2 + $0x24] }
 0x13e   :  { %s304_s17 = vpop.sfrf %303 }
 0x13f   :  { %p1894_p11 = scmp.ne.s32.totalorder %s304_s17, 0 }
 0x141   :  { %308 = shalt.err (%p1894_p11)  }
 0x142   :  { %310 = vsyncmov [#allocation2 + $0x25] }
 0x145   :  { %s311_s18 = vpop.sfrf %310 }
 0x146   :  { %p1895_p12 = scmp.ne.s32.totalorder %s311_s18, 0 }
 0x148   :  { %315 = shalt.err (%p1895_p12)  }
 0x149   :  { %317 = vsyncmov [#allocation2 + $0x26] }
 0x14c   :  { %s318_s19 = vpop.sfrf %317 }
 0x14d   :  { %p1896_p13 = scmp.ne.s32.totalorder %s318_s19, 0 }
 0x14f   :  { %322 = shalt.err (%p1896_p13)  }
 0x150   :  { %324 = vsyncmov [#allocation2 + $0x27] }
 0x153   :  { %s325_s20 = vpop.sfrf %324 }
 0x154   :  { %p1897_p0 = scmp.ne.s32.totalorder %s325_s20, 0 }
 0x156   :  { %329 = shalt.err (%p1897_p0)  }
 0x157   :  { %331 = vsyncmov [#allocation2 + $0x28] }
 0x15a   :  { %s332_s21 = vpop.sfrf %331 }
 0x15b   :  { %p1898_p1 = scmp.ne.s32.totalorder %s332_s21, 0 }
 0x15d   :  { %336 = shalt.err (%p1898_p1)  }
 0x15e   :  { %338 = vsyncmov [#allocation2 + $0x29] }
 0x161   :  { %s339_s22 = vpop.sfrf %338 }
 0x162   :  { %p1899_p2 = scmp.ne.s32.totalorder %s339_s22, 0 }
 0x164   :  { %343 = shalt.err (%p1899_p2)  }
 0x165   :  { %345 = vsyncmov [#allocation2 + $0x2a] }
 0x168   :  { %s346_s23 = vpop.sfrf %345 }
 0x169   :  { %p1900_p3 = scmp.ne.s32.totalorder %s346_s23, 0 }
 0x16b   :  { %350 = shalt.err (%p1900_p3)  }
 0x16c   :  { %352 = vsyncmov [#allocation2 + $0x2b] }
 0x16f   :  { %s353_s24 = vpop.sfrf %352 }
 0x170   :  { %p1901_p4 = scmp.ne.s32.totalorder %s353_s24, 0 }
 0x172   :  { %357 = shalt.err (%p1901_p4)  }
 0x173   :  { %359 = vsyncmov [#allocation2 + $0x2c] }
 0x176   :  { %s360_s0 = vpop.sfrf %359 }
 0x177   :  { %p1902_p5 = scmp.ne.s32.totalorder %s360_s0, 0 }
 0x179   :  { %364 = shalt.err (%p1902_p5)  }
 0x17a   :  { %366 = vsyncmov [#allocation2 + $0x2d] }
 0x17d   :  { %s367_s25 = vpop.sfrf %366 }
 0x17e   :  { %p1903_p6 = scmp.ne.s32.totalorder %s367_s25, 0 }
 0x180   :  { %371 = shalt.err (%p1903_p6)  }
 0x181   :  { %373 = vsyncmov [#allocation2 + $0x2e] }
 0x184   :  { %s374_s26 = vpop.sfrf %373 }
 0x185   :  { %p1904_p7 = scmp.ne.s32.totalorder %s374_s26, 0 }
 0x187   :  { %378 = shalt.err (%p1904_p7)  }
 0x188   :  { %380 = vsyncmov [#allocation2 + $0x2f] }
 0x18b   :  { %s381_s27 = vpop.sfrf %380 }
 0x18c   :  { %p1905_p8 = scmp.ne.s32.totalorder %s381_s27, 0 }
 0x18e   :  { %385 = shalt.err (%p1905_p8)  }
 0x18f   :  { %387 = vsyncmov [#allocation2 + $0x30] }
 0x192   :  { %s388_s28 = vpop.sfrf %387 }
 0x193   :  { %p1906_p9 = scmp.ne.s32.totalorder %s388_s28, 0 }
 0x195   :  { %392 = shalt.err (%p1906_p9)  }
 0x196   :  { %394 = vsyncmov [#allocation2 + $0x31] }
 0x199   :  { %s395_s29 = vpop.sfrf %394 }
 0x19a   :  { %p1907_p10 = scmp.ne.s32.totalorder %s395_s29, 0 }
 0x19c   :  { %399 = shalt.err (%p1907_p10)  }
 0x19d   :  { %401 = vsyncmov [#allocation2 + $0x32] }
 0x1a0   :  { %s402_s30 = vpop.sfrf %401 }
 0x1a1   :  { %p1908_p11 = scmp.ne.s32.totalorder %s402_s30, 0 }
 0x1a3   :  { %406 = shalt.err (%p1908_p11)  }
 0x1a4   :  { %408 = vsyncmov [#allocation2 + $0x33] }
 0x1a7   :  { %s409_s3 = vpop.sfrf %408 }
 0x1a8   :  { %p1909_p12 = scmp.ne.s32.totalorder %s409_s3, 0 }
 0x1aa   :  { %413 = shalt.err (%p1909_p12)  }
 0x1ab   :  { %415 = vsyncmov [#allocation2 + $0x34] }
 0x1ae   :  { %s416_s4 = vpop.sfrf %415 }
 0x1af   :  { %p1910_p13 = scmp.ne.s32.totalorder %s416_s4, 0 }
 0x1b1   :  { %420 = shalt.err (%p1910_p13)  }
 0x1b2   :  { %422 = vsyncmov [#allocation2 + $0x35] }
 0x1b5   :  { %s423_s5 = vpop.sfrf %422 }
 0x1b6   :  { %p1911_p0 = scmp.ne.s32.totalorder %s423_s5, 0 }
 0x1b8   :  { %427 = shalt.err (%p1911_p0)  }
 0x1b9   :  { %429 = vsyncmov [#allocation2 + $0x36] }
 0x1bc   :  { %s430_s6 = vpop.sfrf %429 }
 0x1bd   :  { %p1912_p1 = scmp.ne.s32.totalorder %s430_s6, 0 }
 0x1bf   :  { %434 = shalt.err (%p1912_p1)  }
 0x1c0   :  { %436 = vsyncmov [#allocation2 + $0x37] }
 0x1c3   :  { %s437_s7 = vpop.sfrf %436 }
 0x1c4   :  { %p1913_p2 = scmp.ne.s32.totalorder %s437_s7, 0 }
 0x1c6   :  { %441 = shalt.err (%p1913_p2)  }
 0x1c7   :  { %443 = vsyncmov [#allocation2 + $0x38] }
 0x1ca   :  { %s444_s8 = vpop.sfrf %443 }
 0x1cb   :  { %p1914_p3 = scmp.ne.s32.totalorder %s444_s8, 0 }
 0x1cd   :  { %448 = shalt.err (%p1914_p3)  }
 0x1ce   :  { %450 = vsyncmov [#allocation2 + $0x39] }
 0x1d1   :  { %s451_s9 = vpop.sfrf %450 }
 0x1d2   :  { %p1915_p4 = scmp.ne.s32.totalorder %s451_s9, 0 }
 0x1d4   :  { %455 = shalt.err (%p1915_p4)  }
 0x1d5   :  { %457 = vsyncmov [#allocation2 + $0x3a] }
 0x1d8   :  { %s458_s10 = vpop.sfrf %457 }
 0x1d9   :  { %p1916_p5 = scmp.ne.s32.totalorder %s458_s10, 0 }
 0x1db   :  { %462 = shalt.err (%p1916_p5)  }
 0x1dc   :  { %464 = vsyncmov [#allocation2 + $0x3b] }
 0x1df   :  { %s465_s11 = vpop.sfrf %464 }
 0x1e0   :  { %p1917_p6 = scmp.ne.s32.totalorder %s465_s11, 0 }
 0x1e2   :  { %469 = shalt.err (%p1917_p6)  }
 0x1e3   :  { %471 = vsyncmov [#allocation2 + $0x3c] }
 0x1e6   :  { %s472_s12 = vpop.sfrf %471 }
 0x1e7   :  { %p1918_p7 = scmp.ne.s32.totalorder %s472_s12, 0 }
 0x1e9   :  { %476 = shalt.err (%p1918_p7)  }
 0x1ea   :  { %478 = vsyncmov [#allocation2 + $0x3d] }
 0x1ed   :  { %s479_s13 = vpop.sfrf %478 }
 0x1ee   :  { %p1919_p8 = scmp.ne.s32.totalorder %s479_s13, 0 }
 0x1f0   :  { %483 = shalt.err (%p1919_p8)  }
 0x1f1   :  { %485 = vsyncmov [#allocation2 + $0x3e] }
 0x1f4   :  { %s486_s14 = vpop.sfrf %485 }
 0x1f5   :  { %p1920_p9 = scmp.ne.s32.totalorder %s486_s14, 0 }
 0x1f7   :  { %490 = shalt.err (%p1920_p9)  }
 0x1f8   :  { %492 = vsyncmov [#allocation2 + $0x3f] }
 0x1fb   :  { %s493_s15 = vpop.sfrf %492 }
 0x1fc   :  { %p1921_p10 = scmp.ne.s32.totalorder %s493_s15, 0 }
 0x1fe   :  { %497 = shalt.err (%p1921_p10)  }
 0x1ff   :  { %499 = vsyncmov [#allocation2 + $0x40] }
 0x202   :  { %s500_s1 = vpop.sfrf %499 }
 0x203   :  { %p1922_p11 = scmp.ne.s32.totalorder %s500_s1, 0 }
 0x205   :  { %504 = shalt.err (%p1922_p11)  }
 0x206   :  { %506 = vsyncmov [#allocation2 + $0x41] }
 0x209   :  { %s507_s2 = vpop.sfrf %506 }
 0x20a   :  { %p1923_p12 = scmp.ne.s32.totalorder %s507_s2, 0 }
 0x20c   :  { %511 = shalt.err (%p1923_p12)  }
 0x20d   :  { %513 = vsyncmov [#allocation2 + $0x42] }
 0x210   :  { %s514_s16 = vpop.sfrf %513 }
 0x211   :  { %p1924_p13 = scmp.ne.s32.totalorder %s514_s16, 0 }
 0x213   :  { %518 = shalt.err (%p1924_p13)  }
 0x214   :  { %520 = vsyncmov [#allocation2 + $0x43] }
 0x217   :  { %s521_s17 = vpop.sfrf %520 }
 0x218   :  { %p1925_p0 = scmp.ne.s32.totalorder %s521_s17, 0 }
 0x21a   :  { %525 = shalt.err (%p1925_p0)  }
 0x21b   :  { %527 = vsyncmov [#allocation2 + $0x44] }
 0x21e   :  { %s528_s18 = vpop.sfrf %527 }
 0x21f   :  { %p1926_p1 = scmp.ne.s32.totalorder %s528_s18, 0 }
 0x221   :  { %532 = shalt.err (%p1926_p1)  }
 0x222   :  { %534 = vsyncmov [#allocation2 + $0x45] }
 0x225   :  { %s535_s19 = vpop.sfrf %534 }
 0x226   :  { %p1927_p2 = scmp.ne.s32.totalorder %s535_s19, 0 }
 0x228   :  { %539 = shalt.err (%p1927_p2)  }
 0x229   :  { %541 = vsyncmov [#allocation2 + $0x46] }
 0x22c   :  { %s542_s20 = vpop.sfrf %541 }
 0x22d   :  { %p1928_p3 = scmp.ne.s32.totalorder %s542_s20, 0 }
 0x22f   :  { %546 = shalt.err (%p1928_p3)  }
 0x230   :  { %548 = vsyncmov [#allocation2 + $0x47] }
 0x233   :  { %s549_s21 = vpop.sfrf %548 }
 0x234   :  { %p1929_p4 = scmp.ne.s32.totalorder %s549_s21, 0 }
 0x236   :  { %553 = shalt.err (%p1929_p4)  }
 0x237   :  { %555 = vsyncmov [#allocation2 + $0x48] }
 0x23a   :  { %s556_s22 = vpop.sfrf %555 }
 0x23b   :  { %p1930_p5 = scmp.ne.s32.totalorder %s556_s22, 0 }
 0x23d   :  { %560 = shalt.err (%p1930_p5)  }
 0x23e   :  { %562 = vsyncmov [#allocation2 + $0x49] }
 0x241   :  { %s563_s23 = vpop.sfrf %562 }
 0x242   :  { %p1931_p6 = scmp.ne.s32.totalorder %s563_s23, 0 }
 0x244   :  { %567 = shalt.err (%p1931_p6)  }
 0x245   :  { %569 = vsyncmov [#allocation2 + $0x4a] }
 0x248   :  { %s570_s24 = vpop.sfrf %569 }
 0x249   :  { %p1932_p7 = scmp.ne.s32.totalorder %s570_s24, 0 }
 0x24b   :  { %574 = shalt.err (%p1932_p7)  }
 0x24c   :  { %576 = vsyncmov [#allocation2 + $0x4b] }
 0x24f   :  { %s577_s0 = vpop.sfrf %576 }
 0x250   :  { %p1933_p8 = scmp.ne.s32.totalorder %s577_s0, 0 }
 0x252   :  { %581 = shalt.err (%p1933_p8)  }
 0x253   :  { %583 = vsyncmov [#allocation2 + $0x4c] }
 0x256   :  { %s584_s25 = vpop.sfrf %583 }
 0x257   :  { %p1934_p9 = scmp.ne.s32.totalorder %s584_s25, 0 }
 0x259   :  { %588 = shalt.err (%p1934_p9)  }
 0x25a   :  { %590 = vsyncmov [#allocation2 + $0x4d] }
 0x25d   :  { %s591_s26 = vpop.sfrf %590 }
 0x25e   :  { %p1935_p10 = scmp.ne.s32.totalorder %s591_s26, 0 }
 0x260   :  { %595 = shalt.err (%p1935_p10)  }
 0x261   :  { %597 = vsyncmov [#allocation2 + $0x4e] }
 0x264   :  { %s598_s27 = vpop.sfrf %597 }
 0x265   :  { %p1936_p11 = scmp.ne.s32.totalorder %s598_s27, 0 }
 0x267   :  { %602 = shalt.err (%p1936_p11)  }
 0x268   :  { %604 = vsyncmov [#allocation2 + $0x4f] }
 0x26b   :  { %s605_s28 = vpop.sfrf %604 }
 0x26c   :  { %p1937_p12 = scmp.ne.s32.totalorder %s605_s28, 0 }
 0x26e   :  { %609 = shalt.err (%p1937_p12)  }
 0x26f   :  { %611 = vsyncmov [#allocation2 + $0x50] }
 0x272   :  { %s612_s29 = vpop.sfrf %611 }
 0x273   :  { %p1938_p13 = scmp.ne.s32.totalorder %s612_s29, 0 }
 0x275   :  { %616 = shalt.err (%p1938_p13)  }
 0x276   :  { %618 = vsyncmov [#allocation2 + $0x51] }
 0x279   :  { %s619_s30 = vpop.sfrf %618 }
 0x27a   :  { %p1939_p0 = scmp.ne.s32.totalorder %s619_s30, 0 }
 0x27c   :  { %623 = shalt.err (%p1939_p0)  }
 0x27d   :  { %625 = vsyncmov [#allocation2 + $0x52] }
 0x280   :  { %s626_s3 = vpop.sfrf %625 }
 0x281   :  { %p1940_p1 = scmp.ne.s32.totalorder %s626_s3, 0 }
 0x283   :  { %630 = shalt.err (%p1940_p1)  }
 0x284   :  { %632 = vsyncmov [#allocation2 + $0x53] }
 0x287   :  { %s633_s4 = vpop.sfrf %632 }
 0x288   :  { %p1941_p2 = scmp.ne.s32.totalorder %s633_s4, 0 }
 0x28a   :  { %637 = shalt.err (%p1941_p2)  }
 0x28b   :  { %639 = vsyncmov [#allocation2 + $0x54] }
 0x28e   :  { %s640_s5 = vpop.sfrf %639 }
 0x28f   :  { %p1942_p3 = scmp.ne.s32.totalorder %s640_s5, 0 }
 0x291   :  { %644 = shalt.err (%p1942_p3)  }
 0x292   :  { %646 = vsyncmov [#allocation2 + $0x55] }
 0x295   :  { %s647_s6 = vpop.sfrf %646 }
 0x296   :  { %p1943_p4 = scmp.ne.s32.totalorder %s647_s6, 0 }
 0x298   :  { %651 = shalt.err (%p1943_p4)  }
 0x299   :  { %653 = vsyncmov [#allocation2 + $0x56] }
 0x29c   :  { %s654_s7 = vpop.sfrf %653 }
 0x29d   :  { %p1944_p5 = scmp.ne.s32.totalorder %s654_s7, 0 }
 0x29f   :  { %658 = shalt.err (%p1944_p5)  }
 0x2a0   :  { %660 = vsyncmov [#allocation2 + $0x57] }
 0x2a3   :  { %s661_s8 = vpop.sfrf %660 }
 0x2a4   :  { %p1945_p6 = scmp.ne.s32.totalorder %s661_s8, 0 }
 0x2a6   :  { %665 = shalt.err (%p1945_p6)  }
 0x2a7   :  { %667 = vsyncmov [#allocation2 + $0x58] }
 0x2aa   :  { %s668_s9 = vpop.sfrf %667 }
 0x2ab   :  { %p1946_p7 = scmp.ne.s32.totalorder %s668_s9, 0 }
 0x2ad   :  { %672 = shalt.err (%p1946_p7)  }
 0x2ae   :  { %674 = vsyncmov [#allocation2 + $0x59] }
 0x2b1   :  { %s675_s10 = vpop.sfrf %674 }
 0x2b2   :  { %p1947_p8 = scmp.ne.s32.totalorder %s675_s10, 0 }
 0x2b4   :  { %679 = shalt.err (%p1947_p8)  }
 0x2b5   :  { %681 = vsyncmov [#allocation2 + $0x5a] }
 0x2b8   :  { %s682_s11 = vpop.sfrf %681 }
 0x2b9   :  { %p1948_p9 = scmp.ne.s32.totalorder %s682_s11, 0 }
 0x2bb   :  { %686 = shalt.err (%p1948_p9)  }
 0x2bc   :  { %688 = vsyncmov [#allocation2 + $0x5b] }
 0x2bf   :  { %s689_s12 = vpop.sfrf %688 }
 0x2c0   :  { %p1949_p10 = scmp.ne.s32.totalorder %s689_s12, 0 }
 0x2c2   :  { %693 = shalt.err (%p1949_p10)  }
 0x2c3   :  { %695 = vsyncmov [#allocation2 + $0x5c] }
 0x2c6   :  { %s696_s13 = vpop.sfrf %695 }
 0x2c7   :  { %p1950_p11 = scmp.ne.s32.totalorder %s696_s13, 0 }
 0x2c9   :  { %700 = shalt.err (%p1950_p11)  }
 0x2ca   :  { %702 = vsyncmov [#allocation2 + $0x5d] }
 0x2cd   :  { %s703_s14 = vpop.sfrf %702 }
 0x2ce   :  { %p1951_p12 = scmp.ne.s32.totalorder %s703_s14, 0 }
 0x2d0   :  { %707 = shalt.err (%p1951_p12)  }
 0x2d1   :  { %709 = vsyncmov [#allocation2 + $0x5e] }
 0x2d4   :  { %s710_s15 = vpop.sfrf %709 }
 0x2d5   :  { %p1952_p13 = scmp.ne.s32.totalorder %s710_s15, 0 }
 0x2d7   :  { %714 = shalt.err (%p1952_p13)  }
 0x2d8   :  { %716 = vsyncmov [#allocation2 + $0x5f] }
 0x2db   :  { %s717_s1 = vpop.sfrf %716 }
 0x2dc   :  { %p1953_p0 = scmp.ne.s32.totalorder %s717_s1, 0 }
 0x2de   :  { %721 = shalt.err (%p1953_p0)  }
 0x2df   :  { %723 = vsyncmov [#allocation2 + $0x60] }
 0x2e2   :  { %s724_s2 = vpop.sfrf %723 }
 0x2e3   :  { %p1954_p1 = scmp.ne.s32.totalorder %s724_s2, 0 }
 0x2e5   :  { %728 = shalt.err (%p1954_p1)  }
 0x2e6   :  { %730 = vsyncmov [#allocation2 + $0x61] }
 0x2e9   :  { %s731_s16 = vpop.sfrf %730 }
 0x2ea   :  { %p1955_p2 = scmp.ne.s32.totalorder %s731_s16, 0 }
 0x2ec   :  { %735 = shalt.err (%p1955_p2)  }
 0x2ed   :  { %737 = vsyncmov [#allocation2 + $0x62] }
 0x2f0   :  { %s738_s17 = vpop.sfrf %737 }
 0x2f1   :  { %p1956_p3 = scmp.ne.s32.totalorder %s738_s17, 0 }
 0x2f3   :  { %742 = shalt.err (%p1956_p3)  }
 0x2f4   :  { %744 = vsyncmov [#allocation2 + $0x63] }
 0x2f7   :  { %s745_s18 = vpop.sfrf %744 }
 0x2f8   :  { %p1957_p4 = scmp.ne.s32.totalorder %s745_s18, 0 }
 0x2fa   :  { %749 = shalt.err (%p1957_p4)  }
 0x2fb   :  { %751 = vsyncmov [#allocation2 + $0x64] }
 0x2fe   :  { %s752_s19 = vpop.sfrf %751 }
 0x2ff   :  { %p1958_p5 = scmp.ne.s32.totalorder %s752_s19, 0 }
 0x301   :  { %756 = shalt.err (%p1958_p5)  }
 0x302   :  { %758 = vsyncmov [#allocation2 + $0x65] }
 0x305   :  { %s759_s20 = vpop.sfrf %758 }
 0x306   :  { %p1959_p6 = scmp.ne.s32.totalorder %s759_s20, 0 }
 0x308   :  { %763 = shalt.err (%p1959_p6)  }
 0x309   :  { %765 = vsyncmov [#allocation2 + $0x66] }
 0x30c   :  { %s766_s21 = vpop.sfrf %765 }
 0x30d   :  { %p1960_p7 = scmp.ne.s32.totalorder %s766_s21, 0 }
 0x30f   :  { %770 = shalt.err (%p1960_p7)  }
 0x310   :  { %772 = vsyncmov [#allocation2 + $0x67] }
 0x313   :  { %s773_s22 = vpop.sfrf %772 }
 0x314   :  { %p1961_p8 = scmp.ne.s32.totalorder %s773_s22, 0 }
 0x316   :  { %777 = shalt.err (%p1961_p8)  }
 0x317   :  { %779 = vsyncmov [#allocation2 + $0x68] }
 0x31a   :  { %s780_s23 = vpop.sfrf %779 }
 0x31b   :  { %p1962_p9 = scmp.ne.s32.totalorder %s780_s23, 0 }
 0x31d   :  { %784 = shalt.err (%p1962_p9)  }
 0x31e   :  { %786 = vsyncmov [#allocation2 + $0x69] }
 0x321   :  { %s787_s24 = vpop.sfrf %786 }
 0x322   :  { %p1963_p10 = scmp.ne.s32.totalorder %s787_s24, 0 }
 0x324   :  { %791 = shalt.err (%p1963_p10)  }
 0x325   :  { %793 = vsyncmov [#allocation2 + $0x6a] }
 0x328   :  { %s794_s0 = vpop.sfrf %793 }
 0x329   :  { %p1964_p11 = scmp.ne.s32.totalorder %s794_s0, 0 }
 0x32b   :  { %798 = shalt.err (%p1964_p11)  }
 0x32c   :  { %800 = vsyncmov [#allocation2 + $0x6b] }
 0x32f   :  { %s801_s25 = vpop.sfrf %800 }
 0x330   :  { %p1965_p12 = scmp.ne.s32.totalorder %s801_s25, 0 }
 0x332   :  { %805 = shalt.err (%p1965_p12)  }
 0x333   :  { %807 = vsyncmov [#allocation2 + $0x6c] }
 0x336   :  { %s808_s26 = vpop.sfrf %807 }
 0x337   :  { %p1966_p13 = scmp.ne.s32.totalorder %s808_s26, 0 }
 0x339   :  { %812 = shalt.err (%p1966_p13)  }
 0x33a   :  { %814 = vsyncmov [#allocation2 + $0x6d] }
 0x33d   :  { %s815_s27 = vpop.sfrf %814 }
 0x33e   :  { %p1967_p0 = scmp.ne.s32.totalorder %s815_s27, 0 }
 0x340   :  { %819 = shalt.err (%p1967_p0)  }
 0x341   :  { %821 = vsyncmov [#allocation2 + $0x6e] }
 0x344   :  { %s822_s28 = vpop.sfrf %821 }
 0x345   :  { %p1968_p1 = scmp.ne.s32.totalorder %s822_s28, 0 }
 0x347   :  { %826 = shalt.err (%p1968_p1)  }
 0x348   :  { %828 = vsyncmov [#allocation2 + $0x6f] }
 0x34b   :  { %s829_s29 = vpop.sfrf %828 }
 0x34c   :  { %p1969_p2 = scmp.ne.s32.totalorder %s829_s29, 0 }
 0x34e   :  { %833 = shalt.err (%p1969_p2)  }
 0x34f   :  { %835 = vsyncmov [#allocation2 + $0x70] }
 0x352   :  { %s836_s30 = vpop.sfrf %835 }
 0x353   :  { %p1970_p3 = scmp.ne.s32.totalorder %s836_s30, 0 }
 0x355   :  { %840 = shalt.err (%p1970_p3)  }
 0x356   :  { %842 = vsyncmov [#allocation2 + $0x71] }
 0x359   :  { %s843_s3 = vpop.sfrf %842 }
 0x35a   :  { %p1971_p4 = scmp.ne.s32.totalorder %s843_s3, 0 }
 0x35c   :  { %847 = shalt.err (%p1971_p4)  }
 0x35d   :  { %849 = vsyncmov [#allocation2 + $0x72] }
 0x360   :  { %s850_s4 = vpop.sfrf %849 }
 0x361   :  { %p1972_p5 = scmp.ne.s32.totalorder %s850_s4, 0 }
 0x363   :  { %854 = shalt.err (%p1972_p5)  }
 0x364   :  { %856 = vsyncmov [#allocation2 + $0x73] }
 0x367   :  { %s857_s5 = vpop.sfrf %856 }
 0x368   :  { %p1973_p6 = scmp.ne.s32.totalorder %s857_s5, 0 }
 0x36a   :  { %861 = shalt.err (%p1973_p6)  }
 0x36b   :  { %863 = vsyncmov [#allocation2 + $0x74] }
 0x36e   :  { %s864_s6 = vpop.sfrf %863 }
 0x36f   :  { %p1974_p7 = scmp.ne.s32.totalorder %s864_s6, 0 }
 0x371   :  { %868 = shalt.err (%p1974_p7)  }
 0x372   :  { %870 = vsyncmov [#allocation2 + $0x75] }
 0x375   :  { %s871_s7 = vpop.sfrf %870 }
 0x376   :  { %p1975_p8 = scmp.ne.s32.totalorder %s871_s7, 0 }
 0x378   :  { %875 = shalt.err (%p1975_p8)  }
 0x379   :  { %877 = vsyncmov [#allocation2 + $0x76] }
 0x37c   :  { %s878_s8 = vpop.sfrf %877 }
 0x37d   :  { %p1976_p9 = scmp.ne.s32.totalorder %s878_s8, 0 }
 0x37f   :  { %882 = shalt.err (%p1976_p9)  }
 0x380   :  { %884 = vsyncmov [#allocation2 + $0x77] }
 0x383   :  { %s885_s9 = vpop.sfrf %884 }
 0x384   :  { %p1977_p10 = scmp.ne.s32.totalorder %s885_s9, 0 }
 0x386   :  { %889 = shalt.err (%p1977_p10)  }
 0x387   :  { %891 = vsyncmov [#allocation2 + $0x78] }
 0x38a   :  { %s892_s10 = vpop.sfrf %891 }
 0x38b   :  { %p1978_p11 = scmp.ne.s32.totalorder %s892_s10, 0 }
 0x38d   :  { %896 = shalt.err (%p1978_p11)  }
 0x38e   :  { %898 = vsyncmov [#allocation2 + $0x79] }
 0x391   :  { %s899_s11 = vpop.sfrf %898 }
 0x392   :  { %p1979_p12 = scmp.ne.s32.totalorder %s899_s11, 0 }
 0x394   :  { %903 = shalt.err (%p1979_p12)  }
 0x395   :  { %905 = vsyncmov [#allocation2 + $0x7a] }
 0x398   :  { %s906_s12 = vpop.sfrf %905 }
 0x399   :  { %p1980_p13 = scmp.ne.s32.totalorder %s906_s12, 0 }
 0x39b   :  { %910 = shalt.err (%p1980_p13)  }
 0x39c   :  { %912 = vsyncmov [#allocation2 + $0x7b] }
 0x39f   :  { %s913_s13 = vpop.sfrf %912 }
 0x3a0   :  { %p1981_p0 = scmp.ne.s32.totalorder %s913_s13, 0 }
 0x3a2   :  { %917 = shalt.err (%p1981_p0)  }
 0x3a3   :  { %919 = vsyncmov [#allocation2 + $0x7c] }
 0x3a6   :  { %s920_s14 = vpop.sfrf %919 }
 0x3a7   :  { %p1982_p1 = scmp.ne.s32.totalorder %s920_s14, 0 }
 0x3a9   :  { %924 = shalt.err (%p1982_p1)  }
 0x3aa   :  { %926 = vsyncmov [#allocation2 + $0x7d] }
 0x3ad   :  { %s927_s15 = vpop.sfrf %926 }
 0x3ae   :  { %p1983_p2 = scmp.ne.s32.totalorder %s927_s15, 0 }
 0x3b0   :  { %931 = shalt.err (%p1983_p2)  }
 0x3b1   :  { %933 = vsyncmov [#allocation2 + $0x7e] }
 0x3b4   :  { %s934_s1 = vpop.sfrf %933 }
 0x3b5   :  { %p1984_p3 = scmp.ne.s32.totalorder %s934_s1, 0 }
 0x3b7   :  { %938 = shalt.err (%p1984_p3)  }
 0x3b8   :  { %940 = vsyncmov [#allocation2 + $0x7f] }
 0x3bb   :  { %s941_s2 = vpop.sfrf %940 }
 0x3bc   :  { %p1985_p4 = scmp.ne.s32.totalorder %s941_s2, 0 }
 0x3be   :  { %945 = shalt.err (%p1985_p4)  }
 0x3bf   :  { %947 = vsyncmov [#allocation2 + $0x80] }
 0x3c2   :  { %s948_s16 = vpop.sfrf %947 }
 0x3c3   :  { %p1986_p5 = scmp.ne.s32.totalorder %s948_s16, 0 }
 0x3c5   :  { %952 = shalt.err (%p1986_p5)  }
 0x3c6   :  { %954 = vsyncmov [#allocation2 + $0x81] }
 0x3c9   :  { %s955_s17 = vpop.sfrf %954 }
 0x3ca   :  { %p1987_p6 = scmp.ne.s32.totalorder %s955_s17, 0 }
 0x3cc   :  { %959 = shalt.err (%p1987_p6)  }
 0x3cd   :  { %961 = vsyncmov [#allocation2 + $0x82] }
 0x3d0   :  { %s962_s18 = vpop.sfrf %961 }
 0x3d1   :  { %p1988_p7 = scmp.ne.s32.totalorder %s962_s18, 0 }
 0x3d3   :  { %966 = shalt.err (%p1988_p7)  }
 0x3d4   :  { %968 = vsyncmov [#allocation2 + $0x83] }
 0x3d7   :  { %s969_s19 = vpop.sfrf %968 }
 0x3d8   :  { %p1989_p8 = scmp.ne.s32.totalorder %s969_s19, 0 }
 0x3da   :  { %973 = shalt.err (%p1989_p8)  }
 0x3db   :  { %975 = vsyncmov [#allocation2 + $0x84] }
 0x3de   :  { %s976_s20 = vpop.sfrf %975 }
 0x3df   :  { %p1990_p9 = scmp.ne.s32.totalorder %s976_s20, 0 }
 0x3e1   :  { %980 = shalt.err (%p1990_p9)  }
 0x3e2   :  { %982 = vsyncmov [#allocation2 + $0x85] }
 0x3e5   :  { %s983_s21 = vpop.sfrf %982 }
 0x3e6   :  { %p1991_p10 = scmp.ne.s32.totalorder %s983_s21, 0 }
 0x3e8   :  { %987 = shalt.err (%p1991_p10)  }
 0x3e9   :  { %989 = vsyncmov [#allocation2 + $0x86] }
 0x3ec   :  { %s990_s22 = vpop.sfrf %989 }
 0x3ed   :  { %p1992_p11 = scmp.ne.s32.totalorder %s990_s22, 0 }
 0x3ef   :  { %994 = shalt.err (%p1992_p11)  }
 0x3f0   :  { %996 = vsyncmov [#allocation2 + $0x87] }
 0x3f3   :  { %s997_s23 = vpop.sfrf %996 }
 0x3f4   :  { %p1993_p12 = scmp.ne.s32.totalorder %s997_s23, 0 }
 0x3f6   :  { %1001 = shalt.err (%p1993_p12)  }
 0x3f7   :  { %1003 = vsyncmov [#allocation2 + $0x88] }
 0x3fa   :  { %s1004_s24 = vpop.sfrf %1003 }
 0x3fb   :  { %p1994_p13 = scmp.ne.s32.totalorder %s1004_s24, 0 }
 0x3fd   :  { %1008 = shalt.err (%p1994_p13)  }
 0x3fe   :  { %1010 = vsyncmov [#allocation2 + $0x89] }
 0x401   :  { %s1011_s0 = vpop.sfrf %1010 }
 0x402   :  { %p1995_p0 = scmp.ne.s32.totalorder %s1011_s0, 0 }
 0x404   :  { %1015 = shalt.err (%p1995_p0)  }
 0x405   :  { %1017 = vsyncmov [#allocation2 + $0x8a] }
 0x408   :  { %s1018_s25 = vpop.sfrf %1017 }
 0x409   :  { %p1996_p1 = scmp.ne.s32.totalorder %s1018_s25, 0 }
 0x40b   :  { %1022 = shalt.err (%p1996_p1)  }
 0x40c   :  { %1024 = vsyncmov [#allocation2 + $0x8b] }
 0x40f   :  { %s1025_s26 = vpop.sfrf %1024 }
 0x410   :  { %p1997_p2 = scmp.ne.s32.totalorder %s1025_s26, 0 }
 0x412   :  { %1029 = shalt.err (%p1997_p2)  }
 0x413   :  { %1031 = vsyncmov [#allocation2 + $0x8c] }
 0x416   :  { %s1032_s27 = vpop.sfrf %1031 }
 0x417   :  { %p1998_p3 = scmp.ne.s32.totalorder %s1032_s27, 0 }
 0x419   :  { %1036 = shalt.err (%p1998_p3)  }
 0x41a   :  { %1038 = vsyncmov [#allocation2 + $0x8d] }
 0x41d   :  { %s1039_s28 = vpop.sfrf %1038 }
 0x41e   :  { %p1999_p4 = scmp.ne.s32.totalorder %s1039_s28, 0 }
 0x420   :  { %1043 = shalt.err (%p1999_p4)  }
 0x421   :  { %1045 = vsyncmov [#allocation2 + $0x8e] }
 0x424   :  { %s1046_s29 = vpop.sfrf %1045 }
 0x425   :  { %p2000_p5 = scmp.ne.s32.totalorder %s1046_s29, 0 }
 0x427   :  { %1050 = shalt.err (%p2000_p5)  }
 0x428   :  { %1052 = vsyncmov [#allocation2 + $0x8f] }
 0x42b   :  { %s1053_s30 = vpop.sfrf %1052 }
 0x42c   :  { %p2001_p6 = scmp.ne.s32.totalorder %s1053_s30, 0 }
 0x42e   :  { %1057 = shalt.err (%p2001_p6)  }
 0x42f   :  { %1059 = vsyncmov [#allocation2 + $0x90] }
 0x432   :  { %s1060_s3 = vpop.sfrf %1059 }
 0x433   :  { %p2002_p7 = scmp.ne.s32.totalorder %s1060_s3, 0 }
 0x435   :  { %1064 = shalt.err (%p2002_p7)  }
 0x436   :  { %1066 = vsyncmov [#allocation2 + $0x91] }
 0x439   :  { %s1067_s4 = vpop.sfrf %1066 }
 0x43a   :  { %p2003_p8 = scmp.ne.s32.totalorder %s1067_s4, 0 }
 0x43c   :  { %1071 = shalt.err (%p2003_p8)  }
 0x43d   :  { %1073 = vsyncmov [#allocation2 + $0x92] }
 0x440   :  { %s1074_s5 = vpop.sfrf %1073 }
 0x441   :  { %p2004_p9 = scmp.ne.s32.totalorder %s1074_s5, 0 }
 0x443   :  { %1078 = shalt.err (%p2004_p9)  }
 0x444   :  { %1080 = vsyncmov [#allocation2 + $0x93] }
 0x447   :  { %s1081_s6 = vpop.sfrf %1080 }
 0x448   :  { %p2005_p10 = scmp.ne.s32.totalorder %s1081_s6, 0 }
 0x44a   :  { %1085 = shalt.err (%p2005_p10)  }
 0x44b   :  { %1087 = vsyncmov [#allocation2 + $0x94] }
 0x44e   :  { %s1088_s7 = vpop.sfrf %1087 }
 0x44f   :  { %p2006_p11 = scmp.ne.s32.totalorder %s1088_s7, 0 }
 0x451   :  { %1092 = shalt.err (%p2006_p11)  }
 0x452   :  { %1094 = vsyncmov [#allocation2 + $0x95] }
 0x455   :  { %s1095_s8 = vpop.sfrf %1094 }
 0x456   :  { %p2007_p12 = scmp.ne.s32.totalorder %s1095_s8, 0 }
 0x458   :  { %1099 = shalt.err (%p2007_p12)  }
 0x459   :  { %1101 = vsyncmov [#allocation2 + $0x96] }
 0x45c   :  { %s1102_s9 = vpop.sfrf %1101 }
 0x45d   :  { %p2008_p13 = scmp.ne.s32.totalorder %s1102_s9, 0 }
 0x45f   :  { %1106 = shalt.err (%p2008_p13)  }
 0x460   :  { %1108 = vsyncmov [#allocation2 + $0x97] }
 0x463   :  { %s1109_s10 = vpop.sfrf %1108 }
 0x464   :  { %p2009_p0 = scmp.ne.s32.totalorder %s1109_s10, 0 }
 0x466   :  { %1113 = shalt.err (%p2009_p0)  }
 0x467   :  { %1115 = vsyncmov [#allocation2 + $0x98] }
 0x46a   :  { %s1116_s11 = vpop.sfrf %1115 }
 0x46b   :  { %p2010_p1 = scmp.ne.s32.totalorder %s1116_s11, 0 }
 0x46d   :  { %1120 = shalt.err (%p2010_p1)  }
 0x46e   :  { %1122 = vsyncmov [#allocation2 + $0x99] }
 0x471   :  { %s1123_s12 = vpop.sfrf %1122 }
 0x472   :  { %p2011_p2 = scmp.ne.s32.totalorder %s1123_s12, 0 }
 0x474   :  { %1127 = shalt.err (%p2011_p2)  }
 0x475   :  { %1129 = vsyncmov [#allocation2 + $0x9a] }
 0x478   :  { %s1130_s13 = vpop.sfrf %1129 }
 0x479   :  { %p2012_p3 = scmp.ne.s32.totalorder %s1130_s13, 0 }
 0x47b   :  { %1134 = shalt.err (%p2012_p3)  }
 0x47c   :  { %1136 = vsyncmov [#allocation2 + $0x9b] }
 0x47f   :  { %s1137_s14 = vpop.sfrf %1136 }
 0x480   :  { %p2013_p4 = scmp.ne.s32.totalorder %s1137_s14, 0 }
 0x482   :  { %1141 = shalt.err (%p2013_p4)  }
 0x483   :  { %1143 = vsyncmov [#allocation2 + $0x9c] }
 0x486   :  { %s1144_s15 = vpop.sfrf %1143 }
 0x487   :  { %p2014_p5 = scmp.ne.s32.totalorder %s1144_s15, 0 }
 0x489   :  { %1148 = shalt.err (%p2014_p5)  }
 0x48a   :  { %1150 = vsyncmov [#allocation2 + $0x9d] }
 0x48d   :  { %s1151_s1 = vpop.sfrf %1150 }
 0x48e   :  { %p2015_p6 = scmp.ne.s32.totalorder %s1151_s1, 0 }
 0x490   :  { %1155 = shalt.err (%p2015_p6)  }
 0x491   :  { %1157 = vsyncmov [#allocation2 + $0x9e] }
 0x494   :  { %s1158_s2 = vpop.sfrf %1157 }
 0x495   :  { %p2016_p7 = scmp.ne.s32.totalorder %s1158_s2, 0 }
 0x497   :  { %1162 = shalt.err (%p2016_p7)  }
 0x498   :  { %1164 = vsyncmov [#allocation2 + $0x9f] }
 0x49b   :  { %s1165_s16 = vpop.sfrf %1164 }
 0x49c   :  { %p2017_p8 = scmp.ne.s32.totalorder %s1165_s16, 0 }
 0x49e   :  { %1169 = shalt.err (%p2017_p8)  }
 0x49f   :  { %1171 = vsyncmov [#allocation2 + $0xa0] }
 0x4a2   :  { %s1172_s17 = vpop.sfrf %1171 }
 0x4a3   :  { %p2018_p9 = scmp.ne.s32.totalorder %s1172_s17, 0 }
 0x4a5   :  { %1176 = shalt.err (%p2018_p9)  }
 0x4a6   :  { %1178 = vsyncmov [#allocation2 + $0xa1] }
 0x4a9   :  { %s1179_s18 = vpop.sfrf %1178 }
 0x4aa   :  { %p2019_p10 = scmp.ne.s32.totalorder %s1179_s18, 0 }
 0x4ac   :  { %1183 = shalt.err (%p2019_p10)  }
 0x4ad   :  { %1185 = vsyncmov [#allocation2 + $0xa2] }
 0x4b0   :  { %s1186_s19 = vpop.sfrf %1185 }
 0x4b1   :  { %p2020_p11 = scmp.ne.s32.totalorder %s1186_s19, 0 }
 0x4b3   :  { %1190 = shalt.err (%p2020_p11)  }
 0x4b4   :  { %1192 = vsyncmov [#allocation2 + $0xa3] }
 0x4b7   :  { %s1193_s20 = vpop.sfrf %1192 }
 0x4b8   :  { %p2021_p12 = scmp.ne.s32.totalorder %s1193_s20, 0 }
 0x4ba   :  { %1197 = shalt.err (%p2021_p12)  }
 0x4bb   :  { %1199 = vsyncmov [#allocation2 + $0xa4] }
 0x4be   :  { %s1200_s21 = vpop.sfrf %1199 }
 0x4bf   :  { %p2022_p13 = scmp.ne.s32.totalorder %s1200_s21, 0 }
 0x4c1   :  { %1204 = shalt.err (%p2022_p13)  }
 0x4c2   :  { %1206 = vsyncmov [#allocation2 + $0xa5] }
 0x4c5   :  { %s1207_s22 = vpop.sfrf %1206 }
 0x4c6   :  { %p2023_p0 = scmp.ne.s32.totalorder %s1207_s22, 0 }
 0x4c8   :  { %1211 = shalt.err (%p2023_p0)  }
 0x4c9   :  { %1213 = vsyncmov [#allocation2 + $0xa6] }
 0x4cc   :  { %s1214_s23 = vpop.sfrf %1213 }
 0x4cd   :  { %p2024_p1 = scmp.ne.s32.totalorder %s1214_s23, 0 }
 0x4cf   :  { %1218 = shalt.err (%p2024_p1)  }
 0x4d0   :  { %1220 = vsyncmov [#allocation2 + $0xa7] }
 0x4d3   :  { %s1221_s24 = vpop.sfrf %1220 }
 0x4d4   :  { %p2025_p2 = scmp.ne.s32.totalorder %s1221_s24, 0 }
 0x4d6   :  { %1225 = shalt.err (%p2025_p2)  }
 0x4d7   :  { %1227 = vsyncmov [#allocation2 + $0xa8] }
 0x4da   :  { %s1228_s0 = vpop.sfrf %1227 }
 0x4db   :  { %p2026_p3 = scmp.ne.s32.totalorder %s1228_s0, 0 }
 0x4dd   :  { %1232 = shalt.err (%p2026_p3)  }
 0x4de   :  { %1234 = vsyncmov [#allocation2 + $0xa9] }
 0x4e1   :  { %s1235_s25 = vpop.sfrf %1234 }
 0x4e2   :  { %p2027_p4 = scmp.ne.s32.totalorder %s1235_s25, 0 }
 0x4e4   :  { %1239 = shalt.err (%p2027_p4)  }
 0x4e5   :  { %1241 = vsyncmov [#allocation2 + $0xaa] }
 0x4e8   :  { %s1242_s26 = vpop.sfrf %1241 }
 0x4e9   :  { %p2028_p5 = scmp.ne.s32.totalorder %s1242_s26, 0 }
 0x4eb   :  { %1246 = shalt.err (%p2028_p5)  }
 0x4ec   :  { %1248 = vsyncmov [#allocation2 + $0xab] }
 0x4ef   :  { %s1249_s27 = vpop.sfrf %1248 }
 0x4f0   :  { %p2029_p6 = scmp.ne.s32.totalorder %s1249_s27, 0 }
 0x4f2   :  { %1253 = shalt.err (%p2029_p6)  }
 0x4f3   :  { %1255 = vsyncmov [#allocation2 + $0xac] }
 0x4f6   :  { %s1256_s28 = vpop.sfrf %1255 }
 0x4f7   :  { %p2030_p7 = scmp.ne.s32.totalorder %s1256_s28, 0 }
 0x4f9   :  { %1260 = shalt.err (%p2030_p7)  }
 0x4fa   :  { %1262 = vsyncmov [#allocation2 + $0xad] }
 0x4fd   :  { %s1263_s29 = vpop.sfrf %1262 }
 0x4fe   :  { %p2031_p8 = scmp.ne.s32.totalorder %s1263_s29, 0 }
 0x500   :  { %1267 = shalt.err (%p2031_p8)  }
 0x501   :  { %1269 = vsyncmov [#allocation2 + $0xae] }
 0x504   :  { %s1270_s30 = vpop.sfrf %1269 }
 0x505   :  { %p2032_p9 = scmp.ne.s32.totalorder %s1270_s30, 0 }
 0x507   :  { %1274 = shalt.err (%p2032_p9)  }
 0x508   :  { %1276 = vsyncmov [#allocation2 + $0xaf] }
 0x50b   :  { %s1277_s3 = vpop.sfrf %1276 }
 0x50c   :  { %p2033_p10 = scmp.ne.s32.totalorder %s1277_s3, 0 }
 0x50e   :  { %1281 = shalt.err (%p2033_p10)  }
 0x50f   :  { %1283 = vsyncmov [#allocation2 + $0xb0] }
 0x512   :  { %s1284_s4 = vpop.sfrf %1283 }
 0x513   :  { %p2034_p11 = scmp.ne.s32.totalorder %s1284_s4, 0 }
 0x515   :  { %1288 = shalt.err (%p2034_p11)  }
 0x516   :  { %1290 = vsyncmov [#allocation2 + $0xb1] }
 0x519   :  { %s1291_s5 = vpop.sfrf %1290 }
 0x51a   :  { %p2035_p12 = scmp.ne.s32.totalorder %s1291_s5, 0 }
 0x51c   :  { %1295 = shalt.err (%p2035_p12)  }
 0x51d   :  { %1297 = vsyncmov [#allocation2 + $0xb2] }
 0x520   :  { %s1298_s6 = vpop.sfrf %1297 }
 0x521   :  { %p2036_p13 = scmp.ne.s32.totalorder %s1298_s6, 0 }
 0x523   :  { %1302 = shalt.err (%p2036_p13)  }
 0x524   :  { %1304 = vsyncmov [#allocation2 + $0xb3] }
 0x527   :  { %s1305_s7 = vpop.sfrf %1304 }
 0x528   :  { %p2037_p0 = scmp.ne.s32.totalorder %s1305_s7, 0 }
 0x52a   :  { %1309 = shalt.err (%p2037_p0)  }
 0x52b   :  { %1311 = vsyncmov [#allocation2 + $0xb4] }
 0x52e   :  { %s1312_s8 = vpop.sfrf %1311 }
 0x52f   :  { %p2038_p1 = scmp.ne.s32.totalorder %s1312_s8, 0 }
 0x531   :  { %1316 = shalt.err (%p2038_p1)  }
 0x532   :  { %1318 = vsyncmov [#allocation2 + $0xb5] }
 0x535   :  { %s1319_s9 = vpop.sfrf %1318 }
 0x536   :  { %p2039_p2 = scmp.ne.s32.totalorder %s1319_s9, 0 }
 0x538   :  { %1323 = shalt.err (%p2039_p2)  }
 0x539   :  { %1325 = vsyncmov [#allocation2 + $0xb6] }
 0x53c   :  { %s1326_s10 = vpop.sfrf %1325 }
 0x53d   :  { %p2040_p3 = scmp.ne.s32.totalorder %s1326_s10, 0 }
 0x53f   :  { %1330 = shalt.err (%p2040_p3)  }
 0x540   :  { %1332 = vsyncmov [#allocation2 + $0xb7] }
 0x543   :  { %s1333_s11 = vpop.sfrf %1332 }
 0x544   :  { %p2041_p4 = scmp.ne.s32.totalorder %s1333_s11, 0 }
 0x546   :  { %1337 = shalt.err (%p2041_p4)  }
 0x547   :  { %1339 = vsyncmov [#allocation2 + $0xb8] }
 0x54a   :  { %s1340_s12 = vpop.sfrf %1339 }
 0x54b   :  { %p2042_p5 = scmp.ne.s32.totalorder %s1340_s12, 0 }
 0x54d   :  { %1344 = shalt.err (%p2042_p5)  }
 0x54e   :  { %1346 = vsyncmov [#allocation2 + $0xb9] }
 0x551   :  { %s1347_s13 = vpop.sfrf %1346 }
 0x552   :  { %p2043_p6 = scmp.ne.s32.totalorder %s1347_s13, 0 }
 0x554   :  { %1351 = shalt.err (%p2043_p6)  }
 0x555   :  { %1353 = vsyncmov [#allocation2 + $0xba] }
 0x558   :  { %s1354_s14 = vpop.sfrf %1353 }
 0x559   :  { %p2044_p7 = scmp.ne.s32.totalorder %s1354_s14, 0 }
 0x55b   :  { %1358 = shalt.err (%p2044_p7)  }
 0x55c   :  { %1360 = vsyncmov [#allocation2 + $0xbb] }
 0x55f   :  { %s1361_s15 = vpop.sfrf %1360 }
 0x560   :  { %p2045_p8 = scmp.ne.s32.totalorder %s1361_s15, 0 }
 0x562   :  { %1365 = shalt.err (%p2045_p8)  }
 0x563   :  { %1367 = vsyncmov [#allocation2 + $0xbc] }
 0x566   :  { %s1368_s1 = vpop.sfrf %1367 }
 0x567   :  { %p2046_p9 = scmp.ne.s32.totalorder %s1368_s1, 0 }
 0x569   :  { %1372 = shalt.err (%p2046_p9)  }
 0x56a   :  { %1374 = vsyncmov [#allocation2 + $0xbd] }
 0x56d   :  { %s1375_s2 = vpop.sfrf %1374 }
 0x56e   :  { %p2047_p10 = scmp.ne.s32.totalorder %s1375_s2, 0 }
 0x570   :  { %1379 = shalt.err (%p2047_p10)  }
 0x571   :  { %1381 = vsyncmov [#allocation2 + $0xbe] }
 0x574   :  { %s1382_s16 = vpop.sfrf %1381 }
 0x575   :  { %p2048_p11 = scmp.ne.s32.totalorder %s1382_s16, 0 }
 0x577   :  { %1386 = shalt.err (%p2048_p11)  }
 0x578   :  { %1388 = vsyncmov [#allocation2 + $0xbf] }
 0x57b   :  { %s1389_s17 = vpop.sfrf %1388 }
 0x57c   :  { %p2049_p12 = scmp.ne.s32.totalorder %s1389_s17, 0 }
 0x57e   :  { %1393 = shalt.err (%p2049_p12)  }
 0x57f   :  { %1395 = vsyncmov [#allocation2 + $0xc0] }
 0x582   :  { %s1396_s18 = vpop.sfrf %1395 }
 0x583   :  { %p2050_p13 = scmp.ne.s32.totalorder %s1396_s18, 0 }
 0x585   :  { %1400 = shalt.err (%p2050_p13)  }
 0x586   :  { %1402 = vsyncmov [#allocation2 + $0xc1] }
 0x589   :  { %s1403_s19 = vpop.sfrf %1402 }
 0x58a   :  { %p2051_p0 = scmp.ne.s32.totalorder %s1403_s19, 0 }
 0x58c   :  { %1407 = shalt.err (%p2051_p0)  }
 0x58d   :  { %1409 = vsyncmov [#allocation2 + $0xc2] }
 0x590   :  { %s1410_s20 = vpop.sfrf %1409 }
 0x591   :  { %p2052_p1 = scmp.ne.s32.totalorder %s1410_s20, 0 }
 0x593   :  { %1414 = shalt.err (%p2052_p1)  }
 0x594   :  { %1416 = vsyncmov [#allocation2 + $0xc3] }
 0x597   :  { %s1417_s21 = vpop.sfrf %1416 }
 0x598   :  { %p2053_p2 = scmp.ne.s32.totalorder %s1417_s21, 0 }
 0x59a   :  { %1421 = shalt.err (%p2053_p2)  }
 0x59b   :  { %1423 = vsyncmov [#allocation2 + $0xc4] }
 0x59e   :  { %s1424_s22 = vpop.sfrf %1423 }
 0x59f   :  { %p2054_p3 = scmp.ne.s32.totalorder %s1424_s22, 0 }
 0x5a1   :  { %1428 = shalt.err (%p2054_p3)  }
 0x5a2   :  { %1430 = vsyncmov [#allocation2 + $0xc5] }
 0x5a5   :  { %s1431_s23 = vpop.sfrf %1430 }
 0x5a6   :  { %p2055_p4 = scmp.ne.s32.totalorder %s1431_s23, 0 }
 0x5a8   :  { %1435 = shalt.err (%p2055_p4)  }
 0x5a9   :  { %1437 = vsyncmov [#allocation2 + $0xc6] }
 0x5ac   :  { %s1438_s24 = vpop.sfrf %1437 }
 0x5ad   :  { %p2056_p5 = scmp.ne.s32.totalorder %s1438_s24, 0 }
 0x5af   :  { %1442 = shalt.err (%p2056_p5)  }
 0x5b0   :  { %1444 = vsyncmov [#allocation2 + $0xc7] }
 0x5b3   :  { %s1445_s0 = vpop.sfrf %1444 }
 0x5b4   :  { %p2057_p6 = scmp.ne.s32.totalorder %s1445_s0, 0 }
 0x5b6   :  { %1449 = shalt.err (%p2057_p6)  }
 0x5b7   :  { %1451 = vsyncmov [#allocation2 + $0xc8] }
 0x5ba   :  { %s1452_s25 = vpop.sfrf %1451 }
 0x5bb   :  { %p2058_p7 = scmp.ne.s32.totalorder %s1452_s25, 0 }
 0x5bd   :  { %1456 = shalt.err (%p2058_p7)  }
 0x5be   :  { %1458 = vsyncmov [#allocation2 + $0xc9] }
 0x5c1   :  { %s1459_s26 = vpop.sfrf %1458 }
 0x5c2   :  { %p2059_p8 = scmp.ne.s32.totalorder %s1459_s26, 0 }
 0x5c4   :  { %1463 = shalt.err (%p2059_p8)  }
 0x5c5   :  { %1465 = vsyncmov [#allocation2 + $0xca] }
 0x5c8   :  { %s1466_s27 = vpop.sfrf %1465 }
 0x5c9   :  { %p2060_p9 = scmp.ne.s32.totalorder %s1466_s27, 0 }
 0x5cb   :  { %1470 = shalt.err (%p2060_p9)  }
 0x5cc   :  { %1472 = vsyncmov [#allocation2 + $0xcb] }
 0x5cf   :  { %s1473_s28 = vpop.sfrf %1472 }
 0x5d0   :  { %p2061_p10 = scmp.ne.s32.totalorder %s1473_s28, 0 }
 0x5d2   :  { %1477 = shalt.err (%p2061_p10)  }
 0x5d3   :  { %1479 = vsyncmov [#allocation2 + $0xcc] }
 0x5d6   :  { %s1480_s29 = vpop.sfrf %1479 }
 0x5d7   :  { %p2062_p11 = scmp.ne.s32.totalorder %s1480_s29, 0 }
 0x5d9   :  { %1484 = shalt.err (%p2062_p11)  }
 0x5da   :  { %1486 = vsyncmov [#allocation2 + $0xcd] }
 0x5dd   :  { %s1487_s30 = vpop.sfrf %1486 }
 0x5de   :  { %p2063_p12 = scmp.ne.s32.totalorder %s1487_s30, 0 }
 0x5e0   :  { %1491 = shalt.err (%p2063_p12)  }
 0x5e1   :  { %1493 = vsyncmov [#allocation2 + $0xce] }
 0x5e4   :  { %s1494_s3 = vpop.sfrf %1493 }
 0x5e5   :  { %p2064_p13 = scmp.ne.s32.totalorder %s1494_s3, 0 }
 0x5e7   :  { %1498 = shalt.err (%p2064_p13)  }
 0x5e8   :  { %1500 = vsyncmov [#allocation2 + $0xcf] }
 0x5eb   :  { %s1501_s4 = vpop.sfrf %1500 }
 0x5ec   :  { %p2065_p0 = scmp.ne.s32.totalorder %s1501_s4, 0 }
 0x5ee   :  { %1505 = shalt.err (%p2065_p0)  }
 0x5ef   :  { %1507 = vsyncmov [#allocation2 + $0xd0] }
 0x5f2   :  { %s1508_s5 = vpop.sfrf %1507 }
 0x5f3   :  { %p2066_p1 = scmp.ne.s32.totalorder %s1508_s5, 0 }
 0x5f5   :  { %1512 = shalt.err (%p2066_p1)  }
 0x5f6   :  { %1514 = vsyncmov [#allocation2 + $0xd1] }
 0x5f9   :  { %s1515_s6 = vpop.sfrf %1514 }
 0x5fa   :  { %p2067_p2 = scmp.ne.s32.totalorder %s1515_s6, 0 }
 0x5fc   :  { %1519 = shalt.err (%p2067_p2)  }
 0x5fd   :  { %1521 = vsyncmov [#allocation2 + $0xd2] }
 0x600   :  { %s1522_s7 = vpop.sfrf %1521 }
 0x601   :  { %p2068_p3 = scmp.ne.s32.totalorder %s1522_s7, 0 }
 0x603   :  { %1526 = shalt.err (%p2068_p3)  }
 0x604   :  { %1528 = vsyncmov [#allocation2 + $0xd3] }
 0x607   :  { %s1529_s8 = vpop.sfrf %1528 }
 0x608   :  { %p2069_p4 = scmp.ne.s32.totalorder %s1529_s8, 0 }
 0x60a   :  { %1533 = shalt.err (%p2069_p4)  }
 0x60b   :  { %1535 = vsyncmov [#allocation2 + $0xd4] }
 0x60e   :  { %s1536_s9 = vpop.sfrf %1535 }
 0x60f   :  { %p2070_p5 = scmp.ne.s32.totalorder %s1536_s9, 0 }
 0x611   :  { %1540 = shalt.err (%p2070_p5)  }
 0x612   :  { %1542 = vsyncmov [#allocation2 + $0xd5] }
 0x615   :  { %s1543_s10 = vpop.sfrf %1542 }
 0x616   :  { %p2071_p6 = scmp.ne.s32.totalorder %s1543_s10, 0 }
 0x618   :  { %1547 = shalt.err (%p2071_p6)  }
 0x619   :  { %1549 = vsyncmov [#allocation2 + $0xd6] }
 0x61c   :  { %s1550_s11 = vpop.sfrf %1549 }
 0x61d   :  { %p2072_p7 = scmp.ne.s32.totalorder %s1550_s11, 0 }
 0x61f   :  { %1554 = shalt.err (%p2072_p7)  }
 0x620   :  { %1556 = vsyncmov [#allocation2 + $0xd7] }
 0x623   :  { %s1557_s12 = vpop.sfrf %1556 }
 0x624   :  { %p2073_p8 = scmp.ne.s32.totalorder %s1557_s12, 0 }
 0x626   :  { %1561 = shalt.err (%p2073_p8)  }
 0x627   :  { %1563 = vsyncmov [#allocation2 + $0xd8] }
 0x62a   :  { %s1564_s13 = vpop.sfrf %1563 }
 0x62b   :  { %p2074_p9 = scmp.ne.s32.totalorder %s1564_s13, 0 }
 0x62d   :  { %1568 = shalt.err (%p2074_p9)  }
 0x62e   :  { %1570 = vsyncmov [#allocation2 + $0xd9] }
 0x631   :  { %s1571_s14 = vpop.sfrf %1570 }
 0x632   :  { %p2075_p10 = scmp.ne.s32.totalorder %s1571_s14, 0 }
 0x634   :  { %1575 = shalt.err (%p2075_p10)  }
 0x635   :  { %1577 = vsyncmov [#allocation2 + $0xda] }
 0x638   :  { %s1578_s15 = vpop.sfrf %1577 }
 0x639   :  { %p2076_p11 = scmp.ne.s32.totalorder %s1578_s15, 0 }
 0x63b   :  { %1582 = shalt.err (%p2076_p11)  }
 0x63c   :  { %1584 = vsyncmov [#allocation2 + $0xdb] }
 0x63f   :  { %s1585_s1 = vpop.sfrf %1584 }
 0x640   :  { %p2077_p12 = scmp.ne.s32.totalorder %s1585_s1, 0 }
 0x642   :  { %1589 = shalt.err (%p2077_p12)  }
 0x643   :  { %1591 = vsyncmov [#allocation2 + $0xdc] }
 0x646   :  { %s1592_s2 = vpop.sfrf %1591 }
 0x647   :  { %p2078_p13 = scmp.ne.s32.totalorder %s1592_s2, 0 }
 0x649   :  { %1596 = shalt.err (%p2078_p13)  }
 0x64a   :  { %1598 = vsyncmov [#allocation2 + $0xdd] }
 0x64d   :  { %s1599_s16 = vpop.sfrf %1598 }
 0x64e   :  { %p2079_p0 = scmp.ne.s32.totalorder %s1599_s16, 0 }
 0x650   :  { %1603 = shalt.err (%p2079_p0)  }
 0x651   :  { %1605 = vsyncmov [#allocation2 + $0xde] }
 0x654   :  { %s1606_s17 = vpop.sfrf %1605 }
 0x655   :  { %p2080_p1 = scmp.ne.s32.totalorder %s1606_s17, 0 }
 0x657   :  { %1610 = shalt.err (%p2080_p1)  }
 0x658   :  { %1612 = vsyncmov [#allocation2 + $0xdf] }
 0x65b   :  { %s1613_s18 = vpop.sfrf %1612 }
 0x65c   :  { %p2081_p2 = scmp.ne.s32.totalorder %s1613_s18, 0 }
 0x65e   :  { %1617 = shalt.err (%p2081_p2)  }
 0x65f   :  { %1619 = vsyncmov [#allocation2 + $0xe0] }
 0x662   :  { %s1620_s19 = vpop.sfrf %1619 }
 0x663   :  { %p2082_p3 = scmp.ne.s32.totalorder %s1620_s19, 0 }
 0x665   :  { %1624 = shalt.err (%p2082_p3)  }
 0x666   :  { %1626 = vsyncmov [#allocation2 + $0xe1] }
 0x669   :  { %s1627_s20 = vpop.sfrf %1626 }
 0x66a   :  { %p2083_p4 = scmp.ne.s32.totalorder %s1627_s20, 0 }
 0x66c   :  { %1631 = shalt.err (%p2083_p4)  }
 0x66d   :  { %1633 = vsyncmov [#allocation2 + $0xe2] }
 0x670   :  { %s1634_s21 = vpop.sfrf %1633 }
 0x671   :  { %p2084_p5 = scmp.ne.s32.totalorder %s1634_s21, 0 }
 0x673   :  { %1638 = shalt.err (%p2084_p5)  }
 0x674   :  { %1640 = vsyncmov [#allocation2 + $0xe3] }
 0x677   :  { %s1641_s22 = vpop.sfrf %1640 }
 0x678   :  { %p2085_p6 = scmp.ne.s32.totalorder %s1641_s22, 0 }
 0x67a   :  { %1645 = shalt.err (%p2085_p6)  }
 0x67b   :  { %1647 = vsyncmov [#allocation2 + $0xe4] }
 0x67e   :  { %s1648_s23 = vpop.sfrf %1647 }
 0x67f   :  { %p2086_p7 = scmp.ne.s32.totalorder %s1648_s23, 0 }
 0x681   :  { %1652 = shalt.err (%p2086_p7)  }
 0x682   :  { %1654 = vsyncmov [#allocation2 + $0xe5] }
 0x685   :  { %s1655_s24 = vpop.sfrf %1654 }
 0x686   :  { %p2087_p8 = scmp.ne.s32.totalorder %s1655_s24, 0 }
 0x688   :  { %1659 = shalt.err (%p2087_p8)  }
 0x689   :  { %1661 = vsyncmov [#allocation2 + $0xe6] }
 0x68c   :  { %s1662_s0 = vpop.sfrf %1661 }
 0x68d   :  { %p2088_p9 = scmp.ne.s32.totalorder %s1662_s0, 0 }
 0x68f   :  { %1666 = shalt.err (%p2088_p9)  }
 0x690   :  { %1668 = vsyncmov [#allocation2 + $0xe7] }
 0x693   :  { %s1669_s25 = vpop.sfrf %1668 }
 0x694   :  { %p2089_p10 = scmp.ne.s32.totalorder %s1669_s25, 0 }
 0x696   :  { %1673 = shalt.err (%p2089_p10)  }
 0x697   :  { %1675 = vsyncmov [#allocation2 + $0xe8] }
 0x69a   :  { %s1676_s26 = vpop.sfrf %1675 }
 0x69b   :  { %p2090_p11 = scmp.ne.s32.totalorder %s1676_s26, 0 }
 0x69d   :  { %1680 = shalt.err (%p2090_p11)  }
 0x69e   :  { %1682 = vsyncmov [#allocation2 + $0xe9] }
 0x6a1   :  { %s1683_s27 = vpop.sfrf %1682 }
 0x6a2   :  { %p2091_p12 = scmp.ne.s32.totalorder %s1683_s27, 0 }
 0x6a4   :  { %1687 = shalt.err (%p2091_p12)  }
 0x6a5   :  { %1689 = vsyncmov [#allocation2 + $0xea] }
 0x6a8   :  { %s1690_s28 = vpop.sfrf %1689 }
 0x6a9   :  { %p2092_p13 = scmp.ne.s32.totalorder %s1690_s28, 0 }
 0x6ab   :  { %1694 = shalt.err (%p2092_p13)  }
 0x6ac   :  { %1696 = vsyncmov [#allocation2 + $0xeb] }
 0x6af   :  { %s1697_s29 = vpop.sfrf %1696 }
 0x6b0   :  { %p2093_p0 = scmp.ne.s32.totalorder %s1697_s29, 0 }
 0x6b2   :  { %1701 = shalt.err (%p2093_p0)  }
 0x6b3   :  { %1703 = vsyncmov [#allocation2 + $0xec] }
 0x6b6   :  { %s1704_s30 = vpop.sfrf %1703 }
 0x6b7   :  { %p2094_p1 = scmp.ne.s32.totalorder %s1704_s30, 0 }
 0x6b9   :  { %1708 = shalt.err (%p2094_p1)  }
 0x6ba   :  { %1710 = vsyncmov [#allocation2 + $0xed] }
 0x6bd   :  { %s1711_s3 = vpop.sfrf %1710 }
 0x6be   :  { %p2095_p2 = scmp.ne.s32.totalorder %s1711_s3, 0 }
 0x6c0   :  { %1715 = shalt.err (%p2095_p2)  }
 0x6c1   :  { %1717 = vsyncmov [#allocation2 + $0xee] }
 0x6c4   :  { %s1718_s4 = vpop.sfrf %1717 }
 0x6c5   :  { %p2096_p3 = scmp.ne.s32.totalorder %s1718_s4, 0 }
 0x6c7   :  { %1722 = shalt.err (%p2096_p3)  }
 0x6c8   :  { %1724 = vsyncmov [#allocation2 + $0xef] }
 0x6cb   :  { %s1725_s5 = vpop.sfrf %1724 }
 0x6cc   :  { %p2097_p4 = scmp.ne.s32.totalorder %s1725_s5, 0 }
 0x6ce   :  { %1729 = shalt.err (%p2097_p4)  }
 0x6cf   :  { %1731 = vsyncmov [#allocation2 + $0xf0] }
 0x6d2   :  { %s1732_s6 = vpop.sfrf %1731 }
 0x6d3   :  { %p2098_p5 = scmp.ne.s32.totalorder %s1732_s6, 0 }
 0x6d5   :  { %1736 = shalt.err (%p2098_p5)  }
 0x6d6   :  { %1738 = vsyncmov [#allocation2 + $0xf1] }
 0x6d9   :  { %s1739_s7 = vpop.sfrf %1738 }
 0x6da   :  { %p2099_p6 = scmp.ne.s32.totalorder %s1739_s7, 0 }
 0x6dc   :  { %1743 = shalt.err (%p2099_p6)  }
 0x6dd   :  { %1745 = vsyncmov [#allocation2 + $0xf2] }
 0x6e0   :  { %s1746_s8 = vpop.sfrf %1745 }
 0x6e1   :  { %p2100_p7 = scmp.ne.s32.totalorder %s1746_s8, 0 }
 0x6e3   :  { %1750 = shalt.err (%p2100_p7)  }
 0x6e4   :  { %1752 = vsyncmov [#allocation2 + $0xf3] }
 0x6e7   :  { %s1753_s9 = vpop.sfrf %1752 }
 0x6e8   :  { %p2101_p8 = scmp.ne.s32.totalorder %s1753_s9, 0 }
 0x6ea   :  { %1757 = shalt.err (%p2101_p8)  }
 0x6eb   :  { %1759 = vsyncmov [#allocation2 + $0xf4] }
 0x6ee   :  { %s1760_s10 = vpop.sfrf %1759 }
 0x6ef   :  { %p2102_p9 = scmp.ne.s32.totalorder %s1760_s10, 0 }
 0x6f1   :  { %1764 = shalt.err (%p2102_p9)  }
 0x6f2   :  { %1766 = vsyncmov [#allocation2 + $0xf5] }
 0x6f5   :  { %s1767_s11 = vpop.sfrf %1766 }
 0x6f6   :  { %p2103_p10 = scmp.ne.s32.totalorder %s1767_s11, 0 }
 0x6f8   :  { %1771 = shalt.err (%p2103_p10)  }
 0x6f9   :  { %1773 = vsyncmov [#allocation2 + $0xf6] }
 0x6fc   :  { %s1774_s12 = vpop.sfrf %1773 }
 0x6fd   :  { %p2104_p11 = scmp.ne.s32.totalorder %s1774_s12, 0 }
 0x6ff   :  { %1778 = shalt.err (%p2104_p11)  }
 0x700   :  { %1780 = vsyncmov [#allocation2 + $0xf7] }
 0x703   :  { %s1781_s13 = vpop.sfrf %1780 }
 0x704   :  { %p2105_p12 = scmp.ne.s32.totalorder %s1781_s13, 0 }
 0x706   :  { %1785 = shalt.err (%p2105_p12)  }
 0x707   :  { %1787 = vsyncmov [#allocation2 + $0xf8] }
 0x70a   :  { %s1788_s14 = vpop.sfrf %1787 }
 0x70b   :  { %p2106_p13 = scmp.ne.s32.totalorder %s1788_s14, 0 }
 0x70d   :  { %1792 = shalt.err (%p2106_p13)  }
 0x70e   :  { %1794 = vsyncmov [#allocation2 + $0xf9] }
 0x711   :  { %s1795_s15 = vpop.sfrf %1794 }
 0x712   :  { %p2107_p0 = scmp.ne.s32.totalorder %s1795_s15, 0 }
 0x714   :  { %1799 = shalt.err (%p2107_p0)  }
 0x715   :  { %1801 = vsyncmov [#allocation2 + $0xfa] }
 0x718   :  { %s1802_s1 = vpop.sfrf %1801 }
 0x719   :  { %p2108_p1 = scmp.ne.s32.totalorder %s1802_s1, 0 }
 0x71b   :  { %1806 = shalt.err (%p2108_p1)  }
 0x71c   :  { %1808 = vsyncmov [#allocation2 + $0xfb] }
 0x71f   :  { %s1809_s2 = vpop.sfrf %1808 }
 0x720   :  { %p2109_p2 = scmp.ne.s32.totalorder %s1809_s2, 0 }
 0x722   :  { %1813 = shalt.err (%p2109_p2)  }
 0x723   :  { %1815 = vsyncmov [#allocation2 + $0xfc] }
 0x726   :  { %s1816_s16 = vpop.sfrf %1815 }
 0x727   :  { %p2110_p3 = scmp.ne.s32.totalorder %s1816_s16, 0 }
 0x729   :  { %1820 = shalt.err (%p2110_p3)  }
 0x72a   :  { %1822 = vsyncmov [#allocation2 + $0xfd] }
 0x72d   :  { %s1823_s17 = vpop.sfrf %1822 }
 0x72e   :  { %p2111_p4 = scmp.ne.s32.totalorder %s1823_s17, 0 }
 0x730   :  { %1827 = shalt.err (%p2111_p4)  }
 0x731   :  { %1829 = vsyncmov [#allocation2 + $0xfe] }
 0x734   :  { %s1830_s18 = vpop.sfrf %1829 }
 0x735   :  { %p2112_p5 = scmp.ne.s32.totalorder %s1830_s18, 0 }
 0x737   :  { %1834 = shalt.err (%p2112_p5)  }
 0x738   :  { %1836 = vsyncmov [#allocation2 + $0xff] }
 0x73b   :  { %s1837_s19 = vpop.sfrf %1836 }
 0x73c   :  { %p2113_p6 = scmp.ne.s32.totalorder %s1837_s19, 0 }
 0x73e   :  { %1841 = shalt.err (%p2113_p6)  }

</bundles_post_ra>
